<compile_context>
chip_gen: v6e
topology: v6e:2x2x1
jax: 0.10.0
libtpu: 0.0.40
codegen_flags: <defaults>
</compile_context>

<pallas_src>
import functools

import jax
import jax.numpy as jnp
from jax.experimental import pallas as pl
from jax.experimental.pallas import tpu as pltpu


# ----------------------------------------------------------------------------
# entmax15 (exact, sort-based) — parameter-only preprocessing, plain JAX glue.
# ----------------------------------------------------------------------------
def entmax15(z, axis=-1):
    z = z / 2.0
    z_sorted = -jnp.sort(-z, axis=axis)
    n = z.shape[axis]
    shape = [1] * z.ndim
    shape[axis] = -1
    k = jnp.arange(1, n + 1, dtype=z.dtype).reshape(shape)
    mean = jnp.cumsum(z_sorted, axis=axis) / k
    mean_sq = jnp.cumsum(z_sorted * z_sorted, axis=axis) / k
    ss = k * (mean_sq - mean * mean)
    delta = (1.0 - ss) / k
    delta_nz = jnp.clip(delta, 0.0)
    tau = mean - jnp.sqrt(delta_nz)
    support = jnp.sum((tau <= z_sorted).astype(jnp.int32), axis=axis, keepdims=True)
    tau_star = jnp.take_along_axis(tau, support - 1, axis=axis)
    return jnp.clip(z - tau_star, 0.0) ** 2


def _round_up(v, m):
    return ((v + m - 1) // m) * m


# ----------------------------------------------------------------------------
# Pallas kernel: one grid step == one batch tile; all stages run in-kernel.
# ----------------------------------------------------------------------------
def gflu_kernel(w_zr_ref, b_zr_ref, w_o_ref, b_o_ref, x_ref, h_ref, act_ref,
                *, n_stages, max_unroll=4):
    Fp = x_ref.shape[1]                              # padded feature width
    x_f32 = x_ref[...]                               # (TB, Fp) f32
    act_ref[:, :Fp] = x_f32.astype(jnp.bfloat16)     # x half written once / step
    h0 = x_f32                                       # hidden state stays f32

    def stage(d, h):
        # variable half of the activation <- h (bf16)
        act_ref[:, Fp:] = h.astype(jnp.bfloat16)
        # one fused matmul for both gates: [x | h] @ [[x->z, x->r],[h->z, h->r]]
        zr_pre = jnp.dot(act_ref[...], w_zr_ref[d],
                         preferred_element_type=jnp.float32) + b_zr_ref[d]
        z = jax.nn.sigmoid(zr_pre[:, :Fp])           # f32 gating (v5e-safe)
        r = jax.nn.sigmoid(zr_pre[:, Fp:])           # lane slice at 128 boundary
        # variable half of the activation <- r*h (bf16)
        act_ref[:, Fp:] = (r * h).astype(jnp.bfloat16)
        out_pre = jnp.dot(act_ref[...], w_o_ref[d],
                          preferred_element_type=jnp.float32) + b_o_ref[d]
        h_out = jnp.tanh(out_pre)
        # dropout = 0.0 (eval) -> identity; cheap blend form saves a multiply.
        return h + z * (h_out - h)

    if n_stages <= max_unroll:
        h = h0
        for d in range(n_stages):                    # static unroll (small S)
            h = stage(d, h)
    else:
        h = jax.lax.fori_loop(0, n_stages, stage, h0)

    h_ref[...] = h


def gflu_forward(x, feature_masks, w_in, b_in, w_out, b_out):
    """x: (B, F); feature_masks: (S, F); w_in: (S, 2F, 2F); b_in: (S, 2F);
    w_out: (S, F, 2F); b_out: (S, F).  Returns (B, F) f32."""
    B, F = x.shape
    S = feature_masks.shape[0]

    # ---- padding / tiling geometry: lanes -> 128, sublanes -> 8 ------------
    Fp = max(128, _round_up(F, 128))
    Bp0 = _round_up(B, 8)
    # per-row VMEM cost: double-buffered f32 x & h tiles + bf16 act scratch
    per_row_bytes = 20 * Fp
    TB_cap = max(8, min(512, ((16 << 20) // per_row_bytes) // 8 * 8))
    TB = min(Bp0, TB_cap)
    if Bp0 // TB < 2 and Bp0 >= 16:
        # guarantee >= 2 grid steps so the "parallel" axis can split across
        # v7x's two TensorCores (harmless extra step on v5e/v6e).
        TB = _round_up(Bp0 // 2, 8)
    Bp = _round_up(Bp0, TB)

    # ---- parameter preprocessing (runs once, plain JAX) --------------------
    masks = entmax15(feature_masks.astype(jnp.float32), axis=-1)      # (S, F)
    w_in = w_in.astype(jnp.float32)
    w_out = w_out.astype(jnp.float32)

    # Split W_in by output half (z rows :F / r rows F:) and input half
    # (feature cols :F / h cols F:), transpose to (in, out), fold the entmax
    # mask into the x halves (feature = mask*x  =>  x @ (diag(mask)@W^T)).
    w_x_z = masks[:, :, None] * jnp.transpose(w_in[:, :F, :F], (0, 2, 1))
    w_x_r = masks[:, :, None] * jnp.transpose(w_in[:, F:, :F], (0, 2, 1))
    w_h_z = jnp.transpose(w_in[:, :F, F:], (0, 2, 1))
    w_h_r = jnp.transpose(w_in[:, F:, F:], (0, 2, 1))
    w_x_o = jnp.transpose(w_out[:, :, F:], (0, 2, 1))    # x    -> h_out
    w_rh_o = jnp.transpose(w_out[:, :, :F], (0, 2, 1))   # r*h  -> h_out

    def pad_block(w):   # (S,F,F) -> (S,Fp,Fp), zero padded (inert)
        return jnp.pad(w, ((0, 0), (0, Fp - F), (0, Fp - F)))

    # K/N-fused weights: activation layout is [x | h] (resp. [x | r*h]).
    w_zr = jnp.concatenate(
        [jnp.concatenate([pad_block(w_x_z), pad_block(w_x_r)], axis=2),   # x rows
         jnp.concatenate([pad_block(w_h_z), pad_block(w_h_r)], axis=2)],  # h rows
        axis=1).astype(jnp.bfloat16)                                      # (S,2Fp,2Fp)
    w_o = jnp.concatenate([pad_block(w_x_o), pad_block(w_rh_o)],
                          axis=1).astype(jnp.bfloat16)                    # (S,2Fp,Fp)

    def pad_bias(b):    # (S,F) -> (S,Fp) f32
        return jnp.pad(b.astype(jnp.float32), ((0, 0), (0, Fp - F)))

    b_zr = jnp.concatenate([pad_bias(b_in[:, :F]), pad_bias(b_in[:, F:])],
                           axis=-1)[:, None, :]                           # (S,1,2Fp)
    b_o = pad_bias(b_out)[:, None, :]                                     # (S,1,Fp)

    x_p = jnp.pad(x.astype(jnp.float32), ((0, Bp - B), (0, Fp - F)))

    # ---- VMEM budget: resident (single-buffered) weights + pipelined I/O ---
    weight_bytes = S * (2 * Fp) * (3 * Fp) * 2      # bf16: (2Fp,2Fp)+(2Fp,Fp) per stage
    bias_bytes = S * 3 * Fp * 4
    io_bytes = 2 * (2 * TB * Fp * 4)                # x + h tiles, double-buffered
    scratch_bytes = TB * 2 * Fp * 2                 # bf16 activation scratch
    needed = weight_bytes + bias_bytes + io_bytes + scratch_bytes + (4 << 20)
    try:
        vmem_cap = int(pltpu.get_tpu_info().vmem_capacity_bytes)
    except Exception:
        vmem_cap = 64 << 20                         # conservative (v7x) fallback
    vmem_limit = int(min(max(needed, 32 << 20), vmem_cap - (12 << 20)))
    # TODO(synk): for very large F / S the resident-weight set will not fit even
    # the raised limit; add a K/N tiling grid axis for that regime.

    kernel = functools.partial(gflu_kernel, n_stages=S)
    grid = (Bp // TB,)

    def _run(single_buffer_weights):
        pm = {"pipeline_mode": pl.Buffered(1)} if single_buffer_weights else {}
        w_zr_spec = pl.BlockSpec((S, 2 * Fp, 2 * Fp), lambda b: (0, 0, 0), **pm)
        b_zr_spec = pl.BlockSpec((S, 1, 2 * Fp), lambda b: (0, 0, 0), **pm)
        w_o_spec = pl.BlockSpec((S, 2 * Fp, Fp), lambda b: (0, 0, 0), **pm)
        b_o_spec = pl.BlockSpec((S, 1, Fp), lambda b: (0, 0, 0), **pm)
        x_spec = pl.BlockSpec((TB, Fp), lambda b: (b, 0))
        out = pl.pallas_call(
            kernel,
            out_shape=jax.ShapeDtypeStruct((Bp, Fp), jnp.float32),
            grid_spec=pltpu.PrefetchScalarGridSpec(
                num_scalar_prefetch=0,
                grid=grid,
                in_specs=[w_zr_spec, b_zr_spec, w_o_spec, b_o_spec, x_spec],
                out_specs=x_spec,
                scratch_shapes=[pltpu.VMEM((TB, 2 * Fp), jnp.bfloat16)]),
            compiler_params=pltpu.CompilerParams(
                dimension_semantics=("parallel",),
                vmem_limit_bytes=vmem_limit),
        )(w_zr, b_zr, w_o, b_o, x_p)
        return jax.block_until_ready(out)

    try:
        out = _run(True)
    except Exception:
        # Fallback for environments without single-buffer pipeline_mode support.
        out = _run(False)

    return out[:B, :F]


# ----------------------------------------------------------------------------
# References for correctness checking.
# ----------------------------------------------------------------------------
def gflu_reference_f32(x, feature_masks, w_in, b_in, w_out, b_out):
    """Exact mirror of the PyTorch forward (full f32)."""
    F = x.shape[-1]
    S = feature_masks.shape[0]
    masks = entmax15(feature_masks, axis=-1)
    h = x
    for d in range(S):
        feature = masks[d] * x
        h_in = jnp.concatenate([feature, h], axis=-1) @ w_in[d].T + b_in[d]
        z = jax.nn.sigmoid(h_in[:, :F])
        r = jax.nn.sigmoid(h_in[:, F:])
        h_out = jnp.tanh(jnp.concatenate([r * h, x], axis=-1) @ w_out[d].T + b_out[d])
        h = (1.0 - z) * h + z * h_out
    return h


def gflu_reference_bf16(x, feature_masks, w_in, b_in, w_out, b_out):
    """Same numerical recipe as the kernel (bf16 matmul operands, f32 accum)."""
    F = x.shape[-1]
    S = feature_masks.shape[0]
    masks = entmax15(feature_masks, axis=-1)
    x_bf = x.astype(jnp.bfloat16)
    h = x.astype(jnp.float32)
    for d in range(S):
        w_zf = (masks[d][:, None] * w_in[d, :F, :F].T).astype(jnp.bfloat16)
        w_zh = w_in[d, :F, F:].T.astype(jnp.bfloat16)
        w_rf = (masks[d][:, None] * w_in[d, F:, :F].T).astype(jnp.bfloat16)
        w_rh = w_in[d, F:, F:].T.astype(jnp.bfloat16)
        w_orh = w_out[d, :, :F].T.astype(jnp.bfloat16)
        w_ox = w_out[d, :, F:].T.astype(jnp.bfloat16)
        h_bf = h.astype(jnp.bfloat16)
        z = jax.nn.sigmoid(
            jnp.dot(x_bf, w_zf, preferred_element_type=jnp.float32)
            + jnp.dot(h_bf, w_zh, preferred_element_type=jnp.float32) + b_in[d, :F])
        r = jax.nn.sigmoid(
            jnp.dot(x_bf, w_rf, preferred_element_type=jnp.float32)
            + jnp.dot(h_bf, w_rh, preferred_element_type=jnp.float32) + b_in[d, F:])
        h_out = jnp.tanh(
            jnp.dot((r * h).astype(jnp.bfloat16), w_orh, preferred_element_type=jnp.float32)
            + jnp.dot(x_bf, w_ox, preferred_element_type=jnp.float32) + b_out[d])
        h = (1.0 - z) * h + z * h_out
    return h


if __name__ == "__main__":
    # Small, module-consistent shapes: batch=32, n_features_in=16, n_stages=3.
    # (B=32 exercises the >=2-grid-step batch split used for the 2-TC case.)
    B, F, S = 32, 16, 3
    key = jax.random.PRNGKey(0)
    k_x, k_m, k_wi, k_bi, k_wo, k_bo = jax.random.split(key, 6)

    x = jax.random.normal(k_x, (B, F), dtype=jnp.float32)

    # Deterministic parameter init (shapes from __init__; Beta-sampled masks
    # replaced by uniform(0,1) — the distribution is irrelevant to the kernel).
    feature_masks = jax.random.uniform(k_m, (S, F), dtype=jnp.float32)
    lim = 1.0 / jnp.sqrt(2.0 * F)
    w_in = jax.random.uniform(k_wi, (S, 2 * F, 2 * F), minval=-lim, maxval=lim,
                              dtype=jnp.float32)
    b_in = jax.random.uniform(k_bi, (S, 2 * F), minval=-lim, maxval=lim,
                              dtype=jnp.float32)
    w_out = jax.random.uniform(k_wo, (S, F, 2 * F), minval=-lim, maxval=lim,
                               dtype=jnp.float32)
    b_out = jax.random.uniform(k_bo, (S, F), minval=-lim, maxval=lim,
                               dtype=jnp.float32)

    out = gflu_forward(x, feature_masks, w_in, b_in, w_out, b_out)
    out = jax.block_until_ready(out)
    assert out.shape == (B, F) and out.dtype == jnp.float32

    # Tight check against the bf16-matched reference (same arithmetic recipe,
    # modulo f32 accumulation order of the fused-K/N dots).
    ref_bf16 = gflu_reference_bf16(x, feature_masks, w_in, b_in, w_out, b_out)
    err_bf16 = float(jnp.max(jnp.abs(out - ref_bf16)))
    assert err_bf16 < 2e-3, f"bf16-matched max abs err = {err_bf16}"

    # Loose check against the exact f32 module semantics (bf16 weight rounding).
    ref_f32 = gflu_reference_f32(x, feature_masks, w_in, b_in, w_out, b_out)
    err_f32 = float(jnp.max(jnp.abs(out - ref_f32)))
    assert err_f32 < 5e-2, f"f32-module max abs err = {err_f32}"

    print("KERNEL_OK")
</pallas_src>

<mosaic_0001>
module attributes {stable_mosaic.version = 11 : i64} {
  func.func @gflu_kernel(%arg0: i32, %arg1: memref<3x256x256xbf16, #tpu.memory_space<vmem>>, %arg2: memref<3x1x256xf32, #tpu.memory_space<vmem>>, %arg3: memref<3x256x128xbf16, #tpu.memory_space<vmem>>, %arg4: memref<3x1x128xf32, #tpu.memory_space<vmem>>, %arg5: memref<16x128xf32, #tpu.memory_space<vmem>>, %arg6: memref<16x128xf32, #tpu.memory_space<vmem>>, %arg7: memref<16x256xbf16, #tpu.memory_space<vmem>>) attributes {dimension_semantics = [#tpu.dimension_semantics<parallel>], iteration_bounds = array<i64: 2>, scalar_prefetch = 0 : i64, scratch_operands = 1 : i64, tpu.core_type = #tpu.core_type<tc>, window_params = [{pipeline_mode = #tpu.pipeline_mode<synchronous>, transform_indices = @transform_0, window_bounds = array<i64: 3, 256, 256>}, {pipeline_mode = #tpu.pipeline_mode<synchronous>, transform_indices = @transform_1, window_bounds = array<i64: 3, 1, 256>}, {pipeline_mode = #tpu.pipeline_mode<synchronous>, transform_indices = @transform_2, window_bounds = array<i64: 3, 256, 128>}, {pipeline_mode = #tpu.pipeline_mode<synchronous>, transform_indices = @transform_3, window_bounds = array<i64: 3, 1, 128>}, {transform_indices = @transform_4, window_bounds = array<i64: 16, 128>}, {transform_indices = @transform_5, window_bounds = array<i64: 16, 128>}]} {
    %c0 = arith.constant 0 : index
    %c0_0 = arith.constant 0 : index
    %0 = vector.load %arg5[%c0, %c0_0] : memref<16x128xf32, #tpu.memory_space<vmem>>, vector<16x128xf32>
    %1 = arith.truncf %0 : vector<16x128xf32> to vector<16x128xbf16>
    %c0_1 = arith.constant 0 : index
    %c0_2 = arith.constant 0 : index
    %2 = vector.load %arg7[%c0_1, %c0_2] : memref<16x256xbf16, #tpu.memory_space<vmem>>, vector<16x128xbf16>
    tpu.vector_store %arg7[%c0_1, %c0_2], %1 {strides = array<i32>} : memref<16x256xbf16, #tpu.memory_space<vmem>>, vector<16x128xbf16>,
    %3 = arith.truncf %0 : vector<16x128xf32> to vector<16x128xbf16>
    %c0_3 = arith.constant 0 : index
    %c128 = arith.constant 128 : index
    %4 = vector.load %arg7[%c0_3, %c128] : memref<16x256xbf16, #tpu.memory_space<vmem>>, vector<16x128xbf16>
    tpu.vector_store %arg7[%c0_3, %c128], %3 {strides = array<i32>} : memref<16x256xbf16, #tpu.memory_space<vmem>>, vector<16x128xbf16>,
    %c0_4 = arith.constant 0 : index
    %c0_5 = arith.constant 0 : index
    %5 = vector.load %arg7[%c0_4, %c0_5] : memref<16x256xbf16, #tpu.memory_space<vmem>>, vector<16x256xbf16>
    %c0_6 = arith.constant 0 : index
    %c0_7 = arith.constant 0 : index
    %c0_8 = arith.constant 0 : index
    %6 = vector.load %arg1[%c0_6, %c0_7, %c0_8] : memref<3x256x256xbf16, #tpu.memory_space<vmem>>, vector<1x256x256xbf16>
    %7 = vector.shape_cast %6 : vector<1x256x256xbf16> to vector<256x256xbf16>
    %cst = arith.constant dense<0.000000e+00> : vector<16x256xf32>
    %8 = tpu.matmul %5, %7, %cst {dimension_numbers = #tpu.dot_dimension_numbers<[1], [0], [0], [1], [0, 0, 1, 1], [], []>} : vector<16x256xbf16>, vector<256x256xbf16>, vector<16x256xf32> -> vector<16x256xf32>
    %c0_9 = arith.constant 0 : index
    %c0_10 = arith.constant 0 : index
    %c0_11 = arith.constant 0 : index
    %9 = vector.load %arg2[%c0_9, %c0_10, %c0_11] : memref<3x1x256xf32, #tpu.memory_space<vmem>>, vector<1x1x256xf32>
    %10 = vector.shape_cast %9 : vector<1x1x256xf32> to vector<1x256xf32>
    %11 = vector.broadcast %10 : vector<1x256xf32> to vector<16x256xf32>
    %12 = arith.addf %8, %11 : vector<16x256xf32>
    %13 = vector.extract_strided_slice %12 {offsets = [0, 0], sizes = [16, 128], strides = [1, 1]} : vector<16x256xf32> to vector<16x128xf32>
    %14 = arith.negf %13 : vector<16x128xf32>
    %15 = math.exp %14 : vector<16x128xf32>
    %cst_12 = arith.constant 1.000000e+00 : f32
    %16 = vector.broadcast %cst_12 : f32 to vector<16x128xf32>
    %17 = arith.addf %16, %15 : vector<16x128xf32>
    %18 = arith.divf %16, %17 : vector<16x128xf32>
    %19 = vector.extract_strided_slice %12 {offsets = [0, 128], sizes = [16, 128], strides = [1, 1]} : vector<16x256xf32> to vector<16x128xf32>
    %20 = arith.negf %19 : vector<16x128xf32>
    %21 = math.exp %20 : vector<16x128xf32>
    %cst_13 = arith.constant 1.000000e+00 : f32
    %22 = vector.broadcast %cst_13 : f32 to vector<16x128xf32>
    %23 = arith.addf %22, %21 : vector<16x128xf32>
    %24 = arith.divf %22, %23 : vector<16x128xf32>
    %25 = arith.mulf %24, %0 : vector<16x128xf32>
    %26 = arith.truncf %25 : vector<16x128xf32> to vector<16x128xbf16>
    %c0_14 = arith.constant 0 : index
    %c128_15 = arith.constant 128 : index
    %27 = vector.load %arg7[%c0_14, %c128_15] : memref<16x256xbf16, #tpu.memory_space<vmem>>, vector<16x128xbf16>
    tpu.vector_store %arg7[%c0_14, %c128_15], %26 {strides = array<i32>} : memref<16x256xbf16, #tpu.memory_space<vmem>>, vector<16x128xbf16>,
    %c0_16 = arith.constant 0 : index
    %c0_17 = arith.constant 0 : index
    %28 = vector.load %arg7[%c0_16, %c0_17] : memref<16x256xbf16, #tpu.memory_space<vmem>>, vector<16x256xbf16>
    %c0_18 = arith.constant 0 : index
    %c0_19 = arith.constant 0 : index
    %c0_20 = arith.constant 0 : index
    %29 = vector.load %arg3[%c0_18, %c0_19, %c0_20] : memref<3x256x128xbf16, #tpu.memory_space<vmem>>, vector<1x256x128xbf16>
    %30 = vector.shape_cast %29 : vector<1x256x128xbf16> to vector<256x128xbf16>
    %cst_21 = arith.constant dense<0.000000e+00> : vector<16x128xf32>
    %31 = tpu.matmul %28, %30, %cst_21 {dimension_numbers = #tpu.dot_dimension_numbers<[1], [0], [0], [1], [0, 0, 1, 1], [], []>} : vector<16x256xbf16>, vector<256x128xbf16>, vector<16x128xf32> -> vector<16x128xf32>
    %c0_22 = arith.constant 0 : index
    %c0_23 = arith.constant 0 : index
    %c0_24 = arith.constant 0 : index
    %32 = vector.load %arg4[%c0_22, %c0_23, %c0_24] : memref<3x1x128xf32, #tpu.memory_space<vmem>>, vector<1x1x128xf32>
    %33 = vector.shape_cast %32 : vector<1x1x128xf32> to vector<1x128xf32>
    %34 = vector.broadcast %33 : vector<1x128xf32> to vector<16x128xf32>
    %35 = arith.addf %31, %34 : vector<16x128xf32>
    %36 = math.tanh %35 : vector<16x128xf32>
    %37 = arith.subf %36, %0 : vector<16x128xf32>
    %38 = arith.mulf %18, %37 : vector<16x128xf32>
    %39 = arith.addf %0, %38 : vector<16x128xf32>
    %40 = arith.truncf %39 : vector<16x128xf32> to vector<16x128xbf16>
    %c0_25 = arith.constant 0 : index
    %c128_26 = arith.constant 128 : index
    %41 = vector.load %arg7[%c0_25, %c128_26] : memref<16x256xbf16, #tpu.memory_space<vmem>>, vector<16x128xbf16>
    tpu.vector_store %arg7[%c0_25, %c128_26], %40 {strides = array<i32>} : memref<16x256xbf16, #tpu.memory_space<vmem>>, vector<16x128xbf16>,
    %c0_27 = arith.constant 0 : index
    %c0_28 = arith.constant 0 : index
    %42 = vector.load %arg7[%c0_27, %c0_28] : memref<16x256xbf16, #tpu.memory_space<vmem>>, vector<16x256xbf16>
    %c1 = arith.constant 1 : index
    %c0_29 = arith.constant 0 : index
    %c0_30 = arith.constant 0 : index
    %43 = vector.load %arg1[%c1, %c0_29, %c0_30] : memref<3x256x256xbf16, #tpu.memory_space<vmem>>, vector<1x256x256xbf16>
    %44 = vector.shape_cast %43 : vector<1x256x256xbf16> to vector<256x256xbf16>
    %cst_31 = arith.constant dense<0.000000e+00> : vector<16x256xf32>
    %45 = tpu.matmul %42, %44, %cst_31 {dimension_numbers = #tpu.dot_dimension_numbers<[1], [0], [0], [1], [0, 0, 1, 1], [], []>} : vector<16x256xbf16>, vector<256x256xbf16>, vector<16x256xf32> -> vector<16x256xf32>
    %c1_32 = arith.constant 1 : index
    %c0_33 = arith.constant 0 : index
    %c0_34 = arith.constant 0 : index
    %46 = vector.load %arg2[%c1_32, %c0_33, %c0_34] : memref<3x1x256xf32, #tpu.memory_space<vmem>>, vector<1x1x256xf32>
    %47 = vector.shape_cast %46 : vector<1x1x256xf32> to vector<1x256xf32>
    %48 = vector.broadcast %47 : vector<1x256xf32> to vector<16x256xf32>
    %49 = arith.addf %45, %48 : vector<16x256xf32>
    %50 = vector.extract_strided_slice %49 {offsets = [0, 0], sizes = [16, 128], strides = [1, 1]} : vector<16x256xf32> to vector<16x128xf32>
    %51 = arith.negf %50 : vector<16x128xf32>
    %52 = math.exp %51 : vector<16x128xf32>
    %cst_35 = arith.constant 1.000000e+00 : f32
    %53 = vector.broadcast %cst_35 : f32 to vector<16x128xf32>
    %54 = arith.addf %53, %52 : vector<16x128xf32>
    %55 = arith.divf %53, %54 : vector<16x128xf32>
    %56 = vector.extract_strided_slice %49 {offsets = [0, 128], sizes = [16, 128], strides = [1, 1]} : vector<16x256xf32> to vector<16x128xf32>
    %57 = arith.negf %56 : vector<16x128xf32>
    %58 = math.exp %57 : vector<16x128xf32>
    %cst_36 = arith.constant 1.000000e+00 : f32
    %59 = vector.broadcast %cst_36 : f32 to vector<16x128xf32>
    %60 = arith.addf %59, %58 : vector<16x128xf32>
    %61 = arith.divf %59, %60 : vector<16x128xf32>
    %62 = arith.mulf %61, %39 : vector<16x128xf32>
    %63 = arith.truncf %62 : vector<16x128xf32> to vector<16x128xbf16>
    %c0_37 = arith.constant 0 : index
    %c128_38 = arith.constant 128 : index
    %64 = vector.load %arg7[%c0_37, %c128_38] : memref<16x256xbf16, #tpu.memory_space<vmem>>, vector<16x128xbf16>
    tpu.vector_store %arg7[%c0_37, %c128_38], %63 {strides = array<i32>} : memref<16x256xbf16, #tpu.memory_space<vmem>>, vector<16x128xbf16>,
    %c0_39 = arith.constant 0 : index
    %c0_40 = arith.constant 0 : index
    %65 = vector.load %arg7[%c0_39, %c0_40] : memref<16x256xbf16, #tpu.memory_space<vmem>>, vector<16x256xbf16>
    %c1_41 = arith.constant 1 : index
    %c0_42 = arith.constant 0 : index
    %c0_43 = arith.constant 0 : index
    %66 = vector.load %arg3[%c1_41, %c0_42, %c0_43] : memref<3x256x128xbf16, #tpu.memory_space<vmem>>, vector<1x256x128xbf16>
    %67 = vector.shape_cast %66 : vector<1x256x128xbf16> to vector<256x128xbf16>
    %cst_44 = arith.constant dense<0.000000e+00> : vector<16x128xf32>
    %68 = tpu.matmul %65, %67, %cst_44 {dimension_numbers = #tpu.dot_dimension_numbers<[1], [0], [0], [1], [0, 0, 1, 1], [], []>} : vector<16x256xbf16>, vector<256x128xbf16>, vector<16x128xf32> -> vector<16x128xf32>
    %c1_45 = arith.constant 1 : index
    %c0_46 = arith.constant 0 : index
    %c0_47 = arith.constant 0 : index
    %69 = vector.load %arg4[%c1_45, %c0_46, %c0_47] : memref<3x1x128xf32, #tpu.memory_space<vmem>>, vector<1x1x128xf32>
    %70 = vector.shape_cast %69 : vector<1x1x128xf32> to vector<1x128xf32>
    %71 = vector.broadcast %70 : vector<1x128xf32> to vector<16x128xf32>
    %72 = arith.addf %68, %71 : vector<16x128xf32>
    %73 = math.tanh %72 : vector<16x128xf32>
    %74 = arith.subf %73, %39 : vector<16x128xf32>
    %75 = arith.mulf %55, %74 : vector<16x128xf32>
    %76 = arith.addf %39, %75 : vector<16x128xf32>
    %77 = arith.truncf %76 : vector<16x128xf32> to vector<16x128xbf16>
    %c0_48 = arith.constant 0 : index
    %c128_49 = arith.constant 128 : index
    %78 = vector.load %arg7[%c0_48, %c128_49] : memref<16x256xbf16, #tpu.memory_space<vmem>>, vector<16x128xbf16>
    tpu.vector_store %arg7[%c0_48, %c128_49], %77 {strides = array<i32>} : memref<16x256xbf16, #tpu.memory_space<vmem>>, vector<16x128xbf16>,
    %c0_50 = arith.constant 0 : index
    %c0_51 = arith.constant 0 : index
    %79 = vector.load %arg7[%c0_50, %c0_51] : memref<16x256xbf16, #tpu.memory_space<vmem>>, vector<16x256xbf16>
    %c2 = arith.constant 2 : index
    %c0_52 = arith.constant 0 : index
    %c0_53 = arith.constant 0 : index
    %80 = vector.load %arg1[%c2, %c0_52, %c0_53] : memref<3x256x256xbf16, #tpu.memory_space<vmem>>, vector<1x256x256xbf16>
    %81 = vector.shape_cast %80 : vector<1x256x256xbf16> to vector<256x256xbf16>
    %cst_54 = arith.constant dense<0.000000e+00> : vector<16x256xf32>
    %82 = tpu.matmul %79, %81, %cst_54 {dimension_numbers = #tpu.dot_dimension_numbers<[1], [0], [0], [1], [0, 0, 1, 1], [], []>} : vector<16x256xbf16>, vector<256x256xbf16>, vector<16x256xf32> -> vector<16x256xf32>
    %c2_55 = arith.constant 2 : index
    %c0_56 = arith.constant 0 : index
    %c0_57 = arith.constant 0 : index
    %83 = vector.load %arg2[%c2_55, %c0_56, %c0_57] : memref<3x1x256xf32, #tpu.memory_space<vmem>>, vector<1x1x256xf32>
    %84 = vector.shape_cast %83 : vector<1x1x256xf32> to vector<1x256xf32>
    %85 = vector.broadcast %84 : vector<1x256xf32> to vector<16x256xf32>
    %86 = arith.addf %82, %85 : vector<16x256xf32>
    %87 = vector.extract_strided_slice %86 {offsets = [0, 0], sizes = [16, 128], strides = [1, 1]} : vector<16x256xf32> to vector<16x128xf32>
    %88 = arith.negf %87 : vector<16x128xf32>
    %89 = math.exp %88 : vector<16x128xf32>
    %cst_58 = arith.constant 1.000000e+00 : f32
    %90 = vector.broadcast %cst_58 : f32 to vector<16x128xf32>
    %91 = arith.addf %90, %89 : vector<16x128xf32>
    %92 = arith.divf %90, %91 : vector<16x128xf32>
    %93 = vector.extract_strided_slice %86 {offsets = [0, 128], sizes = [16, 128], strides = [1, 1]} : vector<16x256xf32> to vector<16x128xf32>
    %94 = arith.negf %93 : vector<16x128xf32>
    %95 = math.exp %94 : vector<16x128xf32>
    %cst_59 = arith.constant 1.000000e+00 : f32
    %96 = vector.broadcast %cst_59 : f32 to vector<16x128xf32>
    %97 = arith.addf %96, %95 : vector<16x128xf32>
    %98 = arith.divf %96, %97 : vector<16x128xf32>
    %99 = arith.mulf %98, %76 : vector<16x128xf32>
    %100 = arith.truncf %99 : vector<16x128xf32> to vector<16x128xbf16>
    %c0_60 = arith.constant 0 : index
    %c128_61 = arith.constant 128 : index
    %101 = vector.load %arg7[%c0_60, %c128_61] : memref<16x256xbf16, #tpu.memory_space<vmem>>, vector<16x128xbf16>
    tpu.vector_store %arg7[%c0_60, %c128_61], %100 {strides = array<i32>} : memref<16x256xbf16, #tpu.memory_space<vmem>>, vector<16x128xbf16>,
    %c0_62 = arith.constant 0 : index
    %c0_63 = arith.constant 0 : index
    %102 = vector.load %arg7[%c0_62, %c0_63] : memref<16x256xbf16, #tpu.memory_space<vmem>>, vector<16x256xbf16>
    %c2_64 = arith.constant 2 : index
    %c0_65 = arith.constant 0 : index
    %c0_66 = arith.constant 0 : index
    %103 = vector.load %arg3[%c2_64, %c0_65, %c0_66] : memref<3x256x128xbf16, #tpu.memory_space<vmem>>, vector<1x256x128xbf16>
    %104 = vector.shape_cast %103 : vector<1x256x128xbf16> to vector<256x128xbf16>
    %cst_67 = arith.constant dense<0.000000e+00> : vector<16x128xf32>
    %105 = tpu.matmul %102, %104, %cst_67 {dimension_numbers = #tpu.dot_dimension_numbers<[1], [0], [0], [1], [0, 0, 1, 1], [], []>} : vector<16x256xbf16>, vector<256x128xbf16>, vector<16x128xf32> -> vector<16x128xf32>
    %c2_68 = arith.constant 2 : index
    %c0_69 = arith.constant 0 : index
    %c0_70 = arith.constant 0 : index
    %106 = vector.load %arg4[%c2_68, %c0_69, %c0_70] : memref<3x1x128xf32, #tpu.memory_space<vmem>>, vector<1x1x128xf32>
    %107 = vector.shape_cast %106 : vector<1x1x128xf32> to vector<1x128xf32>
    %108 = vector.broadcast %107 : vector<1x128xf32> to vector<16x128xf32>
    %109 = arith.addf %105, %108 : vector<16x128xf32>
    %110 = math.tanh %109 : vector<16x128xf32>
    %111 = arith.subf %110, %76 : vector<16x128xf32>
    %112 = arith.mulf %92, %111 : vector<16x128xf32>
    %113 = arith.addf %76, %112 : vector<16x128xf32>
    %c0_71 = arith.constant 0 : index
    %c0_72 = arith.constant 0 : index
    %114 = vector.load %arg6[%c0_71, %c0_72] : memref<16x128xf32, #tpu.memory_space<vmem>>, vector<16x128xf32>
    tpu.vector_store %arg6[%c0_71, %c0_72], %113 {strides = array<i32>} : memref<16x128xf32, #tpu.memory_space<vmem>>, vector<16x128xf32>,
    return
  }
  func.func @transform_0(%arg0: i32) -> (i32, i32, i32) {
    %c0_i32 = arith.constant 0 : i32
    %c0_i32_0 = arith.constant 0 : i32
    %c0_i32_1 = arith.constant 0 : i32
    %c0_i32_2 = arith.constant 0 : i32
    return %c0_i32, %c0_i32_0, %c0_i32_1 : i32, i32, i32
  }
  func.func @transform_1(%arg0: i32) -> (i32, i32, i32) {
    %c0_i32 = arith.constant 0 : i32
    %c0_i32_0 = arith.constant 0 : i32
    %c0_i32_1 = arith.constant 0 : i32
    %c0_i32_2 = arith.constant 0 : i32
    return %c0_i32, %c0_i32_0, %c0_i32_1 : i32, i32, i32
  }
  func.func @transform_2(%arg0: i32) -> (i32, i32, i32) {
    %c0_i32 = arith.constant 0 : i32
    %c0_i32_0 = arith.constant 0 : i32
    %c0_i32_1 = arith.constant 0 : i32
    %c0_i32_2 = arith.constant 0 : i32
    return %c0_i32, %c0_i32_0, %c0_i32_1 : i32, i32, i32
  }
  func.func @transform_3(%arg0: i32) -> (i32, i32, i32) {
    %c0_i32 = arith.constant 0 : i32
    %c0_i32_0 = arith.constant 0 : i32
    %c0_i32_1 = arith.constant 0 : i32
    %c0_i32_2 = arith.constant 0 : i32
    return %c0_i32, %c0_i32_0, %c0_i32_1 : i32, i32, i32
  }
  func.func @transform_4(%arg0: i32) -> (i32, i32) {
    %c0_i32 = arith.constant 0 : i32
    %c0_i32_0 = arith.constant 0 : i32
    return %arg0, %c0_i32 : i32, i32
  }
  func.func @transform_5(%arg0: i32) -> (i32, i32) {
    %c0_i32 = arith.constant 0 : i32
    %c0_i32_0 = arith.constant 0 : i32
    return %arg0, %c0_i32 : i32, i32
  }
}

module attributes {stable_mosaic.version = 11 : i64} {
  func.func @gflu_kernel(%arg0: i32, %arg1: memref<3x256x256xbf16, #tpu.memory_space<vmem>>, %arg2: memref<3x1x256xf32, #tpu.memory_space<vmem>>, %arg3: memref<3x256x128xbf16, #tpu.memory_space<vmem>>, %arg4: memref<3x1x128xf32, #tpu.memory_space<vmem>>, %arg5: memref<16x128xf32, #tpu.memory_space<vmem>>, %arg6: memref<16x128xf32, #tpu.memory_space<vmem>>, %arg7: memref<16x256xbf16, #tpu.memory_space<vmem>>) attributes {dimension_semantics = [#tpu.dimension_semantics<parallel>], iteration_bounds = array<i64: 2>, scalar_prefetch = 0 : i64, scratch_operands = 1 : i64, tpu.core_type = #tpu.core_type<tc>, window_params = [{pipeline_mode = #tpu.pipeline_mode<synchronous>, transform_indices = @transform_0, window_bounds = array<i64: 3, 256, 256>}, {pipeline_mode = #tpu.pipeline_mode<synchronous>, transform_indices = @transform_1, window_bounds = array<i64: 3, 1, 256>}, {pipeline_mode = #tpu.pipeline_mode<synchronous>, transform_indices = @transform_2, window_bounds = array<i64: 3, 256, 128>}, {pipeline_mode = #tpu.pipeline_mode<synchronous>, transform_indices = @transform_3, window_bounds = array<i64: 3, 1, 128>}, {transform_indices = @transform_4, window_bounds = array<i64: 16, 128>}, {transform_indices = @transform_5, window_bounds = array<i64: 16, 128>}]} {
    %c0 = arith.constant 0 : index
    %c0_0 = arith.constant 0 : index
    %0 = vector.load %arg5[%c0, %c0_0] : memref<16x128xf32, #tpu.memory_space<vmem>>, vector<16x128xf32>
    %1 = arith.truncf %0 : vector<16x128xf32> to vector<16x128xbf16>
    %c0_1 = arith.constant 0 : index
    %c0_2 = arith.constant 0 : index
    %2 = vector.load %arg7[%c0_1, %c0_2] : memref<16x256xbf16, #tpu.memory_space<vmem>>, vector<16x128xbf16>
    tpu.vector_store %arg7[%c0_1, %c0_2], %1 {strides = array<i32>} : memref<16x256xbf16, #tpu.memory_space<vmem>>, vector<16x128xbf16>,
    %3 = arith.truncf %0 : vector<16x128xf32> to vector<16x128xbf16>
    %c0_3 = arith.constant 0 : index
    %c128 = arith.constant 128 : index
    %4 = vector.load %arg7[%c0_3, %c128] : memref<16x256xbf16, #tpu.memory_space<vmem>>, vector<16x128xbf16>
    tpu.vector_store %arg7[%c0_3, %c128], %3 {strides = array<i32>} : memref<16x256xbf16, #tpu.memory_space<vmem>>, vector<16x128xbf16>,
    %c0_4 = arith.constant 0 : index
    %c0_5 = arith.constant 0 : index
    %5 = vector.load %arg7[%c0_4, %c0_5] : memref<16x256xbf16, #tpu.memory_space<vmem>>, vector<16x256xbf16>
    %c0_6 = arith.constant 0 : index
    %c0_7 = arith.constant 0 : index
    %c0_8 = arith.constant 0 : index
    %6 = vector.load %arg1[%c0_6, %c0_7, %c0_8] : memref<3x256x256xbf16, #tpu.memory_space<vmem>>, vector<1x256x256xbf16>
    %7 = vector.shape_cast %6 : vector<1x256x256xbf16> to vector<256x256xbf16>
    %cst = arith.constant dense<0.000000e+00> : vector<16x256xf32>
    %8 = tpu.matmul %5, %7, %cst {dimension_numbers = #tpu.dot_dimension_numbers<[1], [0], [0], [1], [0, 0, 1, 1], [], []>} : vector<16x256xbf16>, vector<256x256xbf16>, vector<16x256xf32> -> vector<16x256xf32>
    %c0_9 = arith.constant 0 : index
    %c0_10 = arith.constant 0 : index
    %c0_11 = arith.constant 0 : index
    %9 = vector.load %arg2[%c0_9, %c0_10, %c0_11] : memref<3x1x256xf32, #tpu.memory_space<vmem>>, vector<1x1x256xf32>
    %10 = vector.shape_cast %9 : vector<1x1x256xf32> to vector<1x256xf32>
    %11 = vector.broadcast %10 : vector<1x256xf32> to vector<16x256xf32>
    %12 = arith.addf %8, %11 : vector<16x256xf32>
    %13 = vector.extract_strided_slice %12 {offsets = [0, 0], sizes = [16, 128], strides = [1, 1]} : vector<16x256xf32> to vector<16x128xf32>
    %14 = arith.negf %13 : vector<16x128xf32>
    %15 = math.exp %14 : vector<16x128xf32>
    %cst_12 = arith.constant 1.000000e+00 : f32
    %16 = vector.broadcast %cst_12 : f32 to vector<16x128xf32>
    %17 = arith.addf %16, %15 : vector<16x128xf32>
    %18 = arith.divf %16, %17 : vector<16x128xf32>
    %19 = vector.extract_strided_slice %12 {offsets = [0, 128], sizes = [16, 128], strides = [1, 1]} : vector<16x256xf32> to vector<16x128xf32>
    %20 = arith.negf %19 : vector<16x128xf32>
    %21 = math.exp %20 : vector<16x128xf32>
    %cst_13 = arith.constant 1.000000e+00 : f32
    %22 = vector.broadcast %cst_13 : f32 to vector<16x128xf32>
    %23 = arith.addf %22, %21 : vector<16x128xf32>
    %24 = arith.divf %22, %23 : vector<16x128xf32>
    %25 = arith.mulf %24, %0 : vector<16x128xf32>
    %26 = arith.truncf %25 : vector<16x128xf32> to vector<16x128xbf16>
    %c0_14 = arith.constant 0 : index
    %c128_15 = arith.constant 128 : index
    %27 = vector.load %arg7[%c0_14, %c128_15] : memref<16x256xbf16, #tpu.memory_space<vmem>>, vector<16x128xbf16>
    tpu.vector_store %arg7[%c0_14, %c128_15], %26 {strides = array<i32>} : memref<16x256xbf16, #tpu.memory_space<vmem>>, vector<16x128xbf16>,
    %c0_16 = arith.constant 0 : index
    %c0_17 = arith.constant 0 : index
    %28 = vector.load %arg7[%c0_16, %c0_17] : memref<16x256xbf16, #tpu.memory_space<vmem>>, vector<16x256xbf16>
    %c0_18 = arith.constant 0 : index
    %c0_19 = arith.constant 0 : index
    %c0_20 = arith.constant 0 : index
    %29 = vector.load %arg3[%c0_18, %c0_19, %c0_20] : memref<3x256x128xbf16, #tpu.memory_space<vmem>>, vector<1x256x128xbf16>
    %30 = vector.shape_cast %29 : vector<1x256x128xbf16> to vector<256x128xbf16>
    %cst_21 = arith.constant dense<0.000000e+00> : vector<16x128xf32>
    %31 = tpu.matmul %28, %30, %cst_21 {dimension_numbers = #tpu.dot_dimension_numbers<[1], [0], [0], [1], [0, 0, 1, 1], [], []>} : vector<16x256xbf16>, vector<256x128xbf16>, vector<16x128xf32> -> vector<16x128xf32>
    %c0_22 = arith.constant 0 : index
    %c0_23 = arith.constant 0 : index
    %c0_24 = arith.constant 0 : index
    %32 = vector.load %arg4[%c0_22, %c0_23, %c0_24] : memref<3x1x128xf32, #tpu.memory_space<vmem>>, vector<1x1x128xf32>
    %33 = vector.shape_cast %32 : vector<1x1x128xf32> to vector<1x128xf32>
    %34 = vector.broadcast %33 : vector<1x128xf32> to vector<16x128xf32>
    %35 = arith.addf %31, %34 : vector<16x128xf32>
    %36 = math.tanh %35 : vector<16x128xf32>
    %37 = arith.subf %36, %0 : vector<16x128xf32>
    %38 = arith.mulf %18, %37 : vector<16x128xf32>
    %39 = arith.addf %0, %38 : vector<16x128xf32>
    %40 = arith.truncf %39 : vector<16x128xf32> to vector<16x128xbf16>
    %c0_25 = arith.constant 0 : index
    %c128_26 = arith.constant 128 : index
    %41 = vector.load %arg7[%c0_25, %c128_26] : memref<16x256xbf16, #tpu.memory_space<vmem>>, vector<16x128xbf16>
    tpu.vector_store %arg7[%c0_25, %c128_26], %40 {strides = array<i32>} : memref<16x256xbf16, #tpu.memory_space<vmem>>, vector<16x128xbf16>,
    %c0_27 = arith.constant 0 : index
    %c0_28 = arith.constant 0 : index
    %42 = vector.load %arg7[%c0_27, %c0_28] : memref<16x256xbf16, #tpu.memory_space<vmem>>, vector<16x256xbf16>
    %c1 = arith.constant 1 : index
    %c0_29 = arith.constant 0 : index
    %c0_30 = arith.constant 0 : index
    %43 = vector.load %arg1[%c1, %c0_29, %c0_30] : memref<3x256x256xbf16, #tpu.memory_space<vmem>>, vector<1x256x256xbf16>
    %44 = vector.shape_cast %43 : vector<1x256x256xbf16> to vector<256x256xbf16>
    %cst_31 = arith.constant dense<0.000000e+00> : vector<16x256xf32>
    %45 = tpu.matmul %42, %44, %cst_31 {dimension_numbers = #tpu.dot_dimension_numbers<[1], [0], [0], [1], [0, 0, 1, 1], [], []>} : vector<16x256xbf16>, vector<256x256xbf16>, vector<16x256xf32> -> vector<16x256xf32>
    %c1_32 = arith.constant 1 : index
    %c0_33 = arith.constant 0 : index
    %c0_34 = arith.constant 0 : index
    %46 = vector.load %arg2[%c1_32, %c0_33, %c0_34] : memref<3x1x256xf32, #tpu.memory_space<vmem>>, vector<1x1x256xf32>
    %47 = vector.shape_cast %46 : vector<1x1x256xf32> to vector<1x256xf32>
    %48 = vector.broadcast %47 : vector<1x256xf32> to vector<16x256xf32>
    %49 = arith.addf %45, %48 : vector<16x256xf32>
    %50 = vector.extract_strided_slice %49 {offsets = [0, 0], sizes = [16, 128], strides = [1, 1]} : vector<16x256xf32> to vector<16x128xf32>
    %51 = arith.negf %50 : vector<16x128xf32>
    %52 = math.exp %51 : vector<16x128xf32>
    %cst_35 = arith.constant 1.000000e+00 : f32
    %53 = vector.broadcast %cst_35 : f32 to vector<16x128xf32>
    %54 = arith.addf %53, %52 : vector<16x128xf32>
    %55 = arith.divf %53, %54 : vector<16x128xf32>
    %56 = vector.extract_strided_slice %49 {offsets = [0, 128], sizes = [16, 128], strides = [1, 1]} : vector<16x256xf32> to vector<16x128xf32>
    %57 = arith.negf %56 : vector<16x128xf32>
    %58 = math.exp %57 : vector<16x128xf32>
    %cst_36 = arith.constant 1.000000e+00 : f32
    %59 = vector.broadcast %cst_36 : f32 to vector<16x128xf32>
    %60 = arith.addf %59, %58 : vector<16x128xf32>
    %61 = arith.divf %59, %60 : vector<16x128xf32>
    %62 = arith.mulf %61, %39 : vector<16x128xf32>
    %63 = arith.truncf %62 : vector<16x128xf32> to vector<16x128xbf16>
    %c0_37 = arith.constant 0 : index
    %c128_38 = arith.constant 128 : index
    %64 = vector.load %arg7[%c0_37, %c128_38] : memref<16x256xbf16, #tpu.memory_space<vmem>>, vector<16x128xbf16>
    tpu.vector_store %arg7[%c0_37, %c128_38], %63 {strides = array<i32>} : memref<16x256xbf16, #tpu.memory_space<vmem>>, vector<16x128xbf16>,
    %c0_39 = arith.constant 0 : index
    %c0_40 = arith.constant 0 : index
    %65 = vector.load %arg7[%c0_39, %c0_40] : memref<16x256xbf16, #tpu.memory_space<vmem>>, vector<16x256xbf16>
    %c1_41 = arith.constant 1 : index
    %c0_42 = arith.constant 0 : index
    %c0_43 = arith.constant 0 : index
    %66 = vector.load %arg3[%c1_41, %c0_42, %c0_43] : memref<3x256x128xbf16, #tpu.memory_space<vmem>>, vector<1x256x128xbf16>
    %67 = vector.shape_cast %66 : vector<1x256x128xbf16> to vector<256x128xbf16>
    %cst_44 = arith.constant dense<0.000000e+00> : vector<16x128xf32>
    %68 = tpu.matmul %65, %67, %cst_44 {dimension_numbers = #tpu.dot_dimension_numbers<[1], [0], [0], [1], [0, 0, 1, 1], [], []>} : vector<16x256xbf16>, vector<256x128xbf16>, vector<16x128xf32> -> vector<16x128xf32>
    %c1_45 = arith.constant 1 : index
    %c0_46 = arith.constant 0 : index
    %c0_47 = arith.constant 0 : index
    %69 = vector.load %arg4[%c1_45, %c0_46, %c0_47] : memref<3x1x128xf32, #tpu.memory_space<vmem>>, vector<1x1x128xf32>
    %70 = vector.shape_cast %69 : vector<1x1x128xf32> to vector<1x128xf32>
    %71 = vector.broadcast %70 : vector<1x128xf32> to vector<16x128xf32>
    %72 = arith.addf %68, %71 : vector<16x128xf32>
    %73 = math.tanh %72 : vector<16x128xf32>
    %74 = arith.subf %73, %39 : vector<16x128xf32>
    %75 = arith.mulf %55, %74 : vector<16x128xf32>
    %76 = arith.addf %39, %75 : vector<16x128xf32>
    %77 = arith.truncf %76 : vector<16x128xf32> to vector<16x128xbf16>
    %c0_48 = arith.constant 0 : index
    %c128_49 = arith.constant 128 : index
    %78 = vector.load %arg7[%c0_48, %c128_49] : memref<16x256xbf16, #tpu.memory_space<vmem>>, vector<16x128xbf16>
    tpu.vector_store %arg7[%c0_48, %c128_49], %77 {strides = array<i32>} : memref<16x256xbf16, #tpu.memory_space<vmem>>, vector<16x128xbf16>,
    %c0_50 = arith.constant 0 : index
    %c0_51 = arith.constant 0 : index
    %79 = vector.load %arg7[%c0_50, %c0_51] : memref<16x256xbf16, #tpu.memory_space<vmem>>, vector<16x256xbf16>
    %c2 = arith.constant 2 : index
    %c0_52 = arith.constant 0 : index
    %c0_53 = arith.constant 0 : index
    %80 = vector.load %arg1[%c2, %c0_52, %c0_53] : memref<3x256x256xbf16, #tpu.memory_space<vmem>>, vector<1x256x256xbf16>
    %81 = vector.shape_cast %80 : vector<1x256x256xbf16> to vector<256x256xbf16>
    %cst_54 = arith.constant dense<0.000000e+00> : vector<16x256xf32>
    %82 = tpu.matmul %79, %81, %cst_54 {dimension_numbers = #tpu.dot_dimension_numbers<[1], [0], [0], [1], [0, 0, 1, 1], [], []>} : vector<16x256xbf16>, vector<256x256xbf16>, vector<16x256xf32> -> vector<16x256xf32>
    %c2_55 = arith.constant 2 : index
    %c0_56 = arith.constant 0 : index
    %c0_57 = arith.constant 0 : index
    %83 = vector.load %arg2[%c2_55, %c0_56, %c0_57] : memref<3x1x256xf32, #tpu.memory_space<vmem>>, vector<1x1x256xf32>
    %84 = vector.shape_cast %83 : vector<1x1x256xf32> to vector<1x256xf32>
    %85 = vector.broadcast %84 : vector<1x256xf32> to vector<16x256xf32>
    %86 = arith.addf %82, %85 : vector<16x256xf32>
    %87 = vector.extract_strided_slice %86 {offsets = [0, 0], sizes = [16, 128], strides = [1, 1]} : vector<16x256xf32> to vector<16x128xf32>
    %88 = arith.negf %87 : vector<16x128xf32>
    %89 = math.exp %88 : vector<16x128xf32>
    %cst_58 = arith.constant 1.000000e+00 : f32
    %90 = vector.broadcast %cst_58 : f32 to vector<16x128xf32>
    %91 = arith.addf %90, %89 : vector<16x128xf32>
    %92 = arith.divf %90, %91 : vector<16x128xf32>
    %93 = vector.extract_strided_slice %86 {offsets = [0, 128], sizes = [16, 128], strides = [1, 1]} : vector<16x256xf32> to vector<16x128xf32>
    %94 = arith.negf %93 : vector<16x128xf32>
    %95 = math.exp %94 : vector<16x128xf32>
    %cst_59 = arith.constant 1.000000e+00 : f32
    %96 = vector.broadcast %cst_59 : f32 to vector<16x128xf32>
    %97 = arith.addf %96, %95 : vector<16x128xf32>
    %98 = arith.divf %96, %97 : vector<16x128xf32>
    %99 = arith.mulf %98, %76 : vector<16x128xf32>
    %100 = arith.truncf %99 : vector<16x128xf32> to vector<16x128xbf16>
    %c0_60 = arith.constant 0 : index
    %c128_61 = arith.constant 128 : index
    %101 = vector.load %arg7[%c0_60, %c128_61] : memref<16x256xbf16, #tpu.memory_space<vmem>>, vector<16x128xbf16>
    tpu.vector_store %arg7[%c0_60, %c128_61], %100 {strides = array<i32>} : memref<16x256xbf16, #tpu.memory_space<vmem>>, vector<16x128xbf16>,
    %c0_62 = arith.constant 0 : index
    %c0_63 = arith.constant 0 : index
    %102 = vector.load %arg7[%c0_62, %c0_63] : memref<16x256xbf16, #tpu.memory_space<vmem>>, vector<16x256xbf16>
    %c2_64 = arith.constant 2 : index
    %c0_65 = arith.constant 0 : index
    %c0_66 = arith.constant 0 : index
    %103 = vector.load %arg3[%c2_64, %c0_65, %c0_66] : memref<3x256x128xbf16, #tpu.memory_space<vmem>>, vector<1x256x128xbf16>
    %104 = vector.shape_cast %103 : vector<1x256x128xbf16> to vector<256x128xbf16>
    %cst_67 = arith.constant dense<0.000000e+00> : vector<16x128xf32>
    %105 = tpu.matmul %102, %104, %cst_67 {dimension_numbers = #tpu.dot_dimension_numbers<[1], [0], [0], [1], [0, 0, 1, 1], [], []>} : vector<16x256xbf16>, vector<256x128xbf16>, vector<16x128xf32> -> vector<16x128xf32>
    %c2_68 = arith.constant 2 : index
    %c0_69 = arith.constant 0 : index
    %c0_70 = arith.constant 0 : index
    %106 = vector.load %arg4[%c2_68, %c0_69, %c0_70] : memref<3x1x128xf32, #tpu.memory_space<vmem>>, vector<1x1x128xf32>
    %107 = vector.shape_cast %106 : vector<1x1x128xf32> to vector<1x128xf32>
    %108 = vector.broadcast %107 : vector<1x128xf32> to vector<16x128xf32>
    %109 = arith.addf %105, %108 : vector<16x128xf32>
    %110 = math.tanh %109 : vector<16x128xf32>
    %111 = arith.subf %110, %76 : vector<16x128xf32>
    %112 = arith.mulf %92, %111 : vector<16x128xf32>
    %113 = arith.addf %76, %112 : vector<16x128xf32>
    %c0_71 = arith.constant 0 : index
    %c0_72 = arith.constant 0 : index
    %114 = vector.load %arg6[%c0_71, %c0_72] : memref<16x128xf32, #tpu.memory_space<vmem>>, vector<16x128xf32>
    tpu.vector_store %arg6[%c0_71, %c0_72], %113 {strides = array<i32>} : memref<16x128xf32, #tpu.memory_space<vmem>>, vector<16x128xf32>,
    return
  }
  func.func @transform_0(%arg0: i32) -> (i32, i32, i32) {
    %c0_i32 = arith.constant 0 : i32
    %c0_i32_0 = arith.constant 0 : i32
    %c0_i32_1 = arith.constant 0 : i32
    %c0_i32_2 = arith.constant 0 : i32
    return %c0_i32, %c0_i32_0, %c0_i32_1 : i32, i32, i32
  }
  func.func @transform_1(%arg0: i32) -> (i32, i32, i32) {
    %c0_i32 = arith.constant 0 : i32
    %c0_i32_0 = arith.constant 0 : i32
    %c0_i32_1 = arith.constant 0 : i32
    %c0_i32_2 = arith.constant 0 : i32
    return %c0_i32, %c0_i32_0, %c0_i32_1 : i32, i32, i32
  }
  func.func @transform_2(%arg0: i32) -> (i32, i32, i32) {
    %c0_i32 = arith.constant 0 : i32
    %c0_i32_0 = arith.constant 0 : i32
    %c0_i32_1 = arith.constant 0 : i32
    %c0_i32_2 = arith.constant 0 : i32
    return %c0_i32, %c0_i32_0, %c0_i32_1 : i32, i32, i32
  }
  func.func @transform_3(%arg0: i32) -> (i32, i32, i32) {
    %c0_i32 = arith.constant 0 : i32
    %c0_i32_0 = arith.constant 0 : i32
    %c0_i32_1 = arith.constant 0 : i32
    %c0_i32_2 = arith.constant 0 : i32
    return %c0_i32, %c0_i32_0, %c0_i32_1 : i32, i32, i32
  }
  func.func @transform_4(%arg0: i32) -> (i32, i32) {
    %c0_i32 = arith.constant 0 : i32
    %c0_i32_0 = arith.constant 0 : i32
    return %arg0, %c0_i32 : i32, i32
  }
  func.func @transform_5(%arg0: i32) -> (i32, i32) {
    %c0_i32 = arith.constant 0 : i32
    %c0_i32_0 = arith.constant 0 : i32
    return %arg0, %c0_i32 : i32, i32
  }
}

</mosaic_0001>

<bundles_post_ra>
// kernel: tpu_custom_call.1
= control target key start
LH: loop header
LB: loop body
LE: loop exit
PB: predicated region body
PF: predicated region fallthrough
CT: control target
= control target key end

     0   :  { %10 = vsyncpa [#allocation4], 0  ;;  %s3095_s0 = inlined_call_operand.hbm [shape: bf16[3,256,256], index: 0, kind: input, shape index: {}]   ;;  %s3096_s1 = inlined_call_operand.hbm [shape: f32[3,1,256], index: 1, kind: input, shape index: {}]   ;;  %s3097_s2 = inlined_call_operand.hbm [shape: bf16[3,256,128], index: 2, kind: input, shape index: {}]   ;;  %s3098_s3 = inlined_call_operand.vmem [shape: f32[3,1,128], index: 3, kind: input, shape index: {}]   ;;  %s3099_s4 = inlined_call_operand.hbm [shape: f32[32,128], index: 4, kind: input, shape index: {}]   ;;  %s3100_s5 = inlined_call_operand.hbm [shape: f32[32,128], index: 5, kind: output, shape index: {}]  }
   0x1   :  { %11 = vsyncpa [#allocation7], 0 }
   0x2   :  { %12 = vsyncpa [#allocation10], 0 }
   0x3   :  { %14 = vsyncpa [#allocation10 + $0x1], 0 }
   0x4   :  { %15 = vsyncpa [#allocation5], 0 }
   0x5   :  { %17 = vsyncpa [#allocation5 + $0x1], 0  ;;  %s2798_s18 = smov 0   ;;  %s2800_s19 = smov 0  }
   0x6   :  { %s2802_s20 = smov 0   ;;  %s2804_s21 = smov 0  }
   0x7 LB: > { %s2819_s22 = sadd.s32 4294967295, %s2753_s21   ;;  %s1925_s23 = sadd.s32 4294967294, %s2753_s21   ;;  %s2753_s21 = sphi %s2804_s21, %s3126_s21   ;;  %s2749_s20 = sphi %s2802_s20, %s3125_s20   ;;  %s2745_s19 = sphi %s2800_s19, %s3124_s19   ;;  %s2741_s18 = sphi %s2798_s18, %s3123_s18  }
   0x8   : > { %p127_p0 = scmp.ne.s32.totalorder %s2745_s19, %s2741_s18  ;;  %p3101_p1 = scmp.eq.s32.totalorder %s2819_s22, 0 }
   0x9   : > { %p157_p3 = scmp.eq.s32.totalorder %s1925_s23, 1  ;;  %p1926_p5 = scmp.ge.s32.totalorder %s2753_s21, 1 }
   0xa   : > { %p2828_p4 = por %p3101_p1, %p127_p0  ;;  %p164_p7 = scmp.lt.s32.totalorder %s2753_s21, 3 }
   0xb   : > { %p2833_p6 = por %p157_p3, %p127_p0  ;;  %s2755_s27 = smov [#allocation6]  }
   0xc   : > { %s3106_s24 = scalar_select %p2828_p4, 1, 0 }
   0xd   : > { %s3107_s25 = scalar_select %p2833_p6, 1, 0 }
   0xe   : > { %p2838_p8 = pnand %p1926_p5, %p164_p7  ;;  %s189_s28 = sshll.u32 %s2755_s27, 4  ;;  %s190_s28 = int_to_ptr.vmem [resolvable:$true] %s189_s28 }
   0xf   : > { %s2756_s30 = smov [#allocation3]   ;;  %s2586_s7 = scalar_lea.vmem %s190_s28, 96 }
  0x10   : > { %s3108_s26 = scalar_select %p2838_p8, 1, 0 }
  0x11   : > { %p2237_p9 = pneg %p2838_p8  ;;  %s176_s6 = sshll.u32 %s2756_s30, 4  ;;  %s177_s6 = int_to_ptr.vmem [resolvable:$true] %s176_s6 }
  0x12   : > { %p2587_p13 = scmp.ne.s32.totalorder %s190_s28, %s2586_s7  ;;  %p2594_p5 = scmp.lt.s32.totalorder %s190_s28, %s190_s28 }
  0x13   : > { %p2847_p11 = pnand %p2237_p9, %p3101_p1  ;;  %p2595_p7 = scmp.lt.s32.totalorder %s2586_s7, %s2586_s7 }
  0x15   : > { %p2577_p12 = pneg %p2847_p11  ;;  %p2596_p10 = por %p2595_p7, %p2594_p5 }
  0x17   : > { %p2589_p0 = pnand %p2587_p13, %p2577_p12 }
  0x19   : > { %p2590_p3 = pneg %p2589_p0 }
  0x1b   : > { %p2597_p9 = pnand %p2596_p10, %p2590_p3 }
  0x1d   : > { %2600 = shalt.err (!%p2597_p9)
}
  0x1e   : > { %s2757_s8 = smov 32   ;;  %s2758_s9 = smov 2  }
  0x1f   : > { %2243 = dma.hbm_to_vmem [thread:$0]  (!%p2847_p11), %s3096_s1, 96, %s190_s28, [#allocation7], %s2757_s8, %s2757_s8, %s2758_s9  }
  0x20   : > { %s2612_s12 = scalar_lea.vmem %s177_s6, 12288  ;;  %p2620_p2 = scmp.lt.s32.totalorder %s177_s6, %s177_s6 }
  0x21   : > { %p2613_p1 = scmp.ne.s32.totalorder %s177_s6, %s2612_s12  ;;  %p2621_p6 = scmp.lt.s32.totalorder %s2612_s12, %s2612_s12 }
  0x23   : > { %p2615_p13 = pnand %p2613_p1, %p2577_p12  ;;  %p2622_p5 = por %p2621_p6, %p2620_p2 }
  0x25   : > { %p2616_p0 = pneg %p2615_p13 }
  0x27   : > { %p2623_p10 = pnand %p2622_p5, %p2616_p0 }
  0x29   : > { %2626 = shalt.err (!%p2623_p10)
}
  0x2a   : > { %s3102_s13 = smov 128   ;;  %s2760_s14 = smov 8  }
  0x2b   : > { %2240 = dma.hbm_to_vmem [thread:$0]  (!%p2847_p11), %s3095_s0, 12288, %s177_s6, [#allocation4], %s3102_s13, %s3102_s13, %s2760_s14  }
  0x2c   : > { %s2761_s17 = smov [#allocation8]  }
  0x2d   : > { %s202_s23 = sshll.u32 %s2761_s17, 4  ;;  %s203_s23 = int_to_ptr.vmem [resolvable:$true] %s202_s23 }
  0x2e   : > { %s2638_s27 = scalar_lea.vmem %s203_s23, 6144  ;;  %p2646_p3 = scmp.lt.s32.totalorder %s203_s23, %s203_s23 }
  0x2f   : > { %p2639_p1 = scmp.ne.s32.totalorder %s203_s23, %s2638_s27  ;;  %p2647_p7 = scmp.lt.s32.totalorder %s2638_s27, %s2638_s27 }
  0x31   : > { %p2641_p2 = pnand %p2639_p1, %p2577_p12  ;;  %p2648_p9 = por %p2647_p7, %p2646_p3 }
  0x33   : > { %p2642_p6 = pneg %p2641_p2 }
  0x35   : > { %p2649_p13 = pnand %p2648_p9, %p2642_p6 }
  0x37   : > { %2652 = shalt.err (!%p2649_p13)
}
  0x38   : > { %s2762_s28 = smov 64   ;;  %s2763_s30 = smov 4  }
  0x39   : > { %2246 = dma.hbm_to_vmem [thread:$0]  (!%p2847_p11), %s3097_s2, 6144, %s203_s23, [#allocation7], %s2762_s28, %s2762_s28, %s2763_s30  }
  0x3a   : > { %s2881_s8 = sadd.s32 1, %s2753_s21   ;;  %s114_s10 = sadd.s32 1, %s2749_s20 }
  0x3b   : > { %s111_s9 = ssub.s32 %s2753_s21, %s2881_s8  ;;  %p121_p0 = scmp.ne.s32.totalorder %s2749_s20, %s2745_s19 }
  0x3c   : > { %p112_p12 = scmp.eq.s32.totalorder %s111_s9, 0  ;;  %p122_p5 = scmp.eq.s32.totalorder %s2753_s21, 0 }
  0x3d   : > { %p2258_p10 = scmp.lt.s32.totalorder %s2753_s21, 2  ;;  %p3110_p2 = scmp.eq.s32.totalorder %s2819_s22, 1 }
  0x3e   : > { %s2891_s11 = scalar_select %p112_p12, %s2749_s20, %s114_s10  }
  0x3f   : > { %p123_p1 = por %p122_p5, %p121_p0  ;;  %p2895_p6 = por %p3110_p2, %p121_p0 }
  0x40   : > { %s219_s29 = sand.u32 1, %s2749_s20   ;;  %s2130_s15 = sshll.u32 %s2753_s21, 8 }
  0x41   : > { %s3111_s12 = scalar_select %p2895_p6, 1, 0 }
  0x42   : > { %s1931_s16 = sshll.u32 %s219_s29, 4  ;;  %s2904_s27 = scalar_lea.hbm %s3099_s4, %s2130_s15 }
  0x43   : > { %s223_s28 = scalar_lea.vmem [#allocation9], %s1931_s16  ;;  %p2906_p11 = pnand %p2258_p10, %p123_p1 }
  0x44   : > { %s230_s30 = sshll.u32 %s223_s28, 4  ;;  %s2912_s7 = scalar_lea.sflag [#allocation10], %s219_s29  ;;  %s2910_s30 = int_to_ptr.vmem [resolvable:$true] %s230_s30 }
  0x45   : > { %s2653_s9 = scalar_lea.hbm %s2904_s27, 256  ;;  %p2655_p7 = pneg %p2906_p11 }
  0x46   : > { %p2654_p3 = scmp.ne.s32.totalorder %s2904_s27, %s2653_s9  ;;  %s2658_s16 = scalar_lea.hbm %s3099_s4, 512 }
  0x47   : > { %p2659_p12 = scmp.lt.s32.totalorder %s2904_s27, %s3099_s4  ;;  %p2660_p0 = scmp.lt.s32.totalorder %s2658_s16, %s2653_s9 }
  0x48   : > { %p2656_p9 = pnand %p2655_p7, %p2654_p3 }
  0x49   : > { %p2661_p5 = por %p2660_p0, %p2659_p12 }
  0x4a   : > { %p2657_p13 = pneg %p2656_p9 }
  0x4c   : > { %p2662_p10 = pnand %p2661_p5, %p2657_p13 }
  0x4e   : > { %2665 = shalt.err (!%p2662_p10)
}
  0x4f   : > { %s2666_s29 = scalar_lea.vmem %s2910_s30, 256  ;;  %s2764_s28 = smov [#allocation9]  }
  0x50   : > { %p2667_p1 = scmp.ne.s32.totalorder %s2910_s30, %s2666_s29  ;;  %s2671_s13 = sshll.u32 %s2764_s28, 4  ;;  %s2672_s13 = int_to_ptr.vmem [resolvable:$false] %s2671_s13 }
  0x51   : > { %s2673_s10 = scalar_lea.vmem %s2672_s13, 512  ;;  %p2674_p9 = scmp.lt.s32.totalorder %s2910_s30, %s2672_s13 }
  0x52   : > { %p2669_p2 = pnand %p2667_p1, %p2655_p7  ;;  %p2675_p6 = scmp.lt.s32.totalorder %s2673_s10, %s2666_s29 }
  0x54   : > { %p2670_p3 = pneg %p2669_p2  ;;  %p2676_p4 = por %p2675_p6, %p2674_p9 }
  0x56   : > { %p2677_p8 = pnand %p2676_p4, %p2670_p3 }
  0x58   : > { %2680 = shalt.err (!%p2677_p8)
}
  0x59   : > { %s3113_s9 = smov 128   ;;  %p3114_p7 = scmp.ne.s32.totalorder %s3108_s26, 0 }
  0x5a   : > { %2250 = dma.hbm_to_vmem [thread:$0]  (!%p2906_p11), %s2904_s27, 256, %s2910_s30, %s2912_s7, %s3113_s9, %s3113_s9, %s2760_s14  }
  0x5b   : > { %242 = sbr.rel (%p3114_p7) target bundleno = 1613 (0x64d), region = 40  ;;  %p3115_p13 = scmp.eq.s32.totalorder (!%p3114_p7), %s2819_s22, 0 }
  0x60   : > { %2724 = dma.done.wait (%p3115_p13), [#allocation4], 12288   ;;  %p3116_p12 = pmov %p3115_p13 }
  0x62   : > { %2726 = vsyncadd (%p3116_p12), [#allocation4], 4294955008  ;;  %p3117_p4 = pmov %p3116_p12 }
  0x64   : > { %2728 = dma.done.wait (%p3117_p4), [#allocation7], 6240   ;;  %p3118_p8 = pmov %p3117_p4 }
  0x65   : > { %s2947_s13 = sand.u32 1, %s2745_s19   ;;  %p3119_p6 = scmp.ne.s32.totalorder %s3106_s24, 0 }
  0x66   : > { %2730 = vsyncadd (%p3118_p8), [#allocation7], 4294961056  ;;  %s1938_s26 = sshll.u32 %s2947_s13, 4  ;;  %s257_s14 = scalar_lea.sflag [#allocation10], %s2947_s13 }
  0x67   : > { %s260_s27 = scalar_lea.vmem [#allocation9], %s1938_s26 }
  0x68   : > { %2732 = dma.done.wait (%p3119_p6), %s257_s14, 256  }
  0x69   : > { %2734 = vsyncadd (%p3119_p6), %s257_s14, 4294967040  ;;  %v2306_v0 = vld [vmem:[#allocation3 + $0x74] ss:$8 sps:$4 sm:$0xff]   ;;  %v2308_v1 = vld [vmem:[#allocation3 + $0x70] ss:$8 sps:$4 sm:$0xff]   ;;  %v340_v54 = vlaneseq  ;;  %s2143_s17 = sshll.u32 %s2819_s22, 8 }
  0x6a   : > { %520 = vmatprep.subr.bf16.mxu0 %v2306_v0  ;;  %v2309_v2 = vld [vmem:[#allocation3 + $0x64] ss:$8 sps:$4 sm:$0xff]   ;;  %v2311_v3 = vld [vmem:[#allocation3 + $0x60] ss:$8 sps:$4 sm:$0xff]   ;;  %v2312_v4 = vld [vmem:[#allocation3 + $0x54] ss:$8 sps:$4 sm:$0xff]   ;;  %s3049_s9 = scalar_lea.hbm %s3100_s5, %s2143_s17 }
  0x6b   : > { %521 = vmatpush1.bf16.msra.mxu0 %v2308_v1  ;;  %v2314_v5 = vld [vmem:[#allocation3 + $0x50] ss:$8 sps:$4 sm:$0xff]   ;;  %v2315_v6 = vld [vmem:[#allocation3 + $0x44] ss:$8 sps:$4 sm:$0xff]   ;;  %v2317_v7 = vld [vmem:[#allocation3 + $0x40] ss:$8 sps:$4 sm:$0xff]  }
  0x6c   : > { %522 = vmatprep.subr.bf16.mxu0 %v2309_v2  ;;  %v2318_v8 = vld [vmem:[#allocation3 + $0x34] ss:$8 sps:$4 sm:$0xff]   ;;  %v2320_v9 = vld [vmem:[#allocation3 + $0x30] ss:$8 sps:$4 sm:$0xff]   ;;  %v2321_v10 = vld [vmem:[#allocation3 + $0x24] ss:$8 sps:$4 sm:$0xff]  }
  0x6d   : > { %v2323_v11 = vld [vmem:[#allocation3 + $0x20] ss:$8 sps:$4 sm:$0xff]   ;;  %v2324_v12 = vld [vmem:[#allocation3 + $0x14] ss:$8 sps:$4 sm:$0xff]   ;;  %v2326_v13 = vld [vmem:[#allocation3 + $0x10] ss:$8 sps:$4 sm:$0xff]  }
  0x6e   : > { %v2957_v14 = vld [vmem:[%s260_s27] sm:$0xff]  ;;  %v2959_v15 = vld [vmem:[%s260_s27 + $0x8] sm:$0xff]  ;;  %v2967_v55 = vshrl.u32 %v340_v54, 7  ;;  %s286_s23 = scalar_lea.vmem [#allocation11], %s1938_s26  ;;  %s1808_s22 = scalar_lea.sflag [#allocation5], %s2947_s13 }
  0x6f   : > { %523 = vmatpush1.bf16.msra.mxu0 %v2311_v3  ;;  %v2327_v16 = vld [vmem:[#allocation3 + $0x4] ss:$8 sps:$4 sm:$0xff]   ;;  %v2147_v17 = vpack.c.bf16 %v2957_v14, %v2957_v14  ;;  %v2152_v18 = vpack.c.bf16 %v2959_v15, %v2959_v15  ;;  %v2573_v19 = vpack.c.bf16 %v2959_v15, %v2957_v14  ;;  %v2329_v20 = vld [vmem:[#allocation3] ss:$8 sps:$4 sm:$0xff]   ;;  %v2330_v21 = vld [vmem:[#allocation3 + $0xf4] ss:$8 sps:$4 sm:$0xff]  }
  0x70   : > { %524 = vmatprep.subr.bf16.mxu0 %v2312_v4  ;;  %v2332_v22 = vld [vmem:[#allocation3 + $0xf0] ss:$8 sps:$4 sm:$0xff]   ;;  %v2333_v23 = vld [vmem:[#allocation3 + $0xe4] ss:$8 sps:$4 sm:$0xff]   ;;  %v2335_v24 = vld [vmem:[#allocation3 + $0xe0] ss:$8 sps:$4 sm:$0xff]  }
  0x71   : > { %2148 = vst [vmem:[#allocation2] sm:$0xff] %v2147_v17   ;;  %2154 = vst [vmem:[#allocation2 + $0x8] sm:$0xff] %v2152_v18   ;;  %552 = vmatprep.mubr.bf16.mxu0 %v2573_v19  ;;  %v2336_v25 = vld [vmem:[#allocation3 + $0xd4] ss:$8 sps:$4 sm:$0xff]   ;;  %v2338_v26 = vld [vmem:[#allocation3 + $0xd0] ss:$8 sps:$4 sm:$0xff]  }
  0x72   : > { %v2339_v27 = vld [vmem:[#allocation3 + $0xc4] ss:$8 sps:$4 sm:$0xff]   ;;  %v2341_v28 = vld [vmem:[#allocation3 + $0xc0] ss:$8 sps:$4 sm:$0xff]   ;;  %v2342_v29 = vld [vmem:[#allocation3 + $0xb4] ss:$8 sps:$4 sm:$0xff]  }
  0x73   : > { %525 = vmatpush1.bf16.msra.mxu0 %v2314_v5  ;;  %v2344_v30 = vld [vmem:[#allocation3 + $0xb0] ss:$8 sps:$4 sm:$0xff]   ;;  %v2345_v31 = vld [vmem:[#allocation3 + $0xa4] ss:$8 sps:$4 sm:$0xff]   ;;  %v2347_v32 = vld [vmem:[#allocation3 + $0xa0] ss:$8 sps:$4 sm:$0xff]  }
  0x74   : > { %526 = vmatprep.subr.bf16.mxu0 %v2315_v6  ;;  %v2348_v33 = vld [vmem:[#allocation3 + $0x94] ss:$8 sps:$4 sm:$0xff]   ;;  %v2350_v34 = vld [vmem:[#allocation3 + $0x90] ss:$8 sps:$4 sm:$0xff]   ;;  %v2351_v35 = vld [vmem:[#allocation3 + $0x84] ss:$8 sps:$4 sm:$0xff]  }
  0x75   : > { %v2353_v36 = vld [vmem:[#allocation3 + $0x80] ss:$8 sps:$4 sm:$0xff]   ;;  %v2356_v39 = vld [vmem:[#allocation8 + $0x70] sm:$0xff]   ;;  %v2358_v41 = vld [vmem:[#allocation8 + $0x68] sm:$0xff]   ;;  %v2970_v56 = vsub.s32 1, %v2967_v55  ;;  %s1821_s29 = sshll.u32 %s286_s23, 4  ;;  %s3051_s29 = int_to_ptr.vmem [resolvable:$true] %s1821_s29 }
  0x76   : > { %v2354_v37 = vld [vmem:[#allocation8 + $0x78] sm:$0xff]   ;;  %v2357_v40 = vld [vmem:[#allocation8 + $0x30] sm:$0xff]   ;;  %v2359_v42 = vld [vmem:[#allocation8 + $0x28] sm:$0xff]   ;;  %s2681_s14 = scalar_lea.vmem %s3051_s29, 256  ;;  %p3120_p0 = scmp.ne.s32.totalorder %s3111_s12, 0 }
  0x77   : > { %527 = vmatpush1.bf16.msra.mxu0 %v2317_v7  ;;  %v2355_v38 = vld [vmem:[#allocation8 + $0x38] sm:$0xff]   ;;  %2155 = vmatprep.subr.bf16.mxu1 %v2354_v37  ;;  %v2360_v43 = vld [vmem:[#allocation8 + $0x60] sm:$0xff]   ;;  %v2364_v47 = vld [vmem:[#allocation8 + $0x50] sm:$0xff]   ;;  %p2682_p11 = scmp.ne.s32.totalorder %s3051_s29, %s2681_s14  ;;  %s2765_s26 = smov [#allocation11]  }
  0x78   : > { %528 = vmatprep.subr.bf16.mxu0 %v2318_v8  ;;  %2156 = vmatpush3.bf16.msra.mxu1 %v2355_v38  ;;  %v2361_v44 = vld [vmem:[#allocation8 + $0x20] sm:$0xff]   ;;  %v2362_v45 = vld [vmem:[#allocation8 + $0x58] sm:$0xff]   ;;  %v2365_v48 = vld [vmem:[#allocation8 + $0x10] sm:$0xff]   ;;  %s2685_s27 = sshll.u32 %s2765_s26, 4  ;;  %s2686_s27 = int_to_ptr.vmem [resolvable:$false] %s2685_s27 }
  0x79   : > { %2157 = vmatprep.subr.bf16.mxu1 %v2356_v39  ;;  %v2363_v46 = vld [vmem:[#allocation8 + $0x18] sm:$0xff]   ;;  %v2366_v49 = vld [vmem:[#allocation8 + $0x48] sm:$0xff]   ;;  %v2368_v51 = vld [vmem:[#allocation8 + $0x40] sm:$0xff]   ;;  %p2683_p5 = pnand %p2682_p11, %p3120_p0  ;;  %s2687_s24 = scalar_lea.vmem %s2686_s27, 512 }
  0x7a   : > { %v2367_v50 = vld [vmem:[#allocation8 + $0x8] sm:$0xff]   ;;  %v2369_v52 = vld [vmem:[#allocation8] sm:$0xff]   ;;  %v2972_v57 = vld [vmem:[#allocation6] sm:$0x3]  ;;  %p2688_p1 = scmp.lt.s32.totalorder %s3051_s29, %s2686_s27  ;;  %p2689_p2 = scmp.lt.s32.totalorder %s2687_s24, %s2681_s14 }
  0x7b   : > { %529 = vmatpush1.bf16.msra.mxu0 %v2320_v9  ;;  %v2375_v53 = vld [vmem:[#allocation3 + $0x174] ss:$8 sps:$4 sm:$0xff]   ;;  %v347_v58 = vrot.slane %v2972_v57, %v2970_v56  ;;  %v2372_v17 = vld [vmem:[#allocation2] ss:$8 sps:$4 sm:$0xff]   ;;  %v2378_v18 = vld [vmem:[#allocation3 + $0x164] ss:$8 sps:$4 sm:$0xff]   ;;  %p2684_p10 = pneg %p2683_p5 }
  0x7c   : > { %530 = vmatprep.subr.bf16.mxu0 %v2321_v10  ;;  %2158 = vmatpush3.bf16.msra.mxu1 %v2357_v40  ;;  %v2403_v37 = vld [vmem:[#allocation3 + $0x1d0] ss:$8 sps:$4 sm:$0xff]   ;;  %v2408_v38 = vld [vmem:[#allocation3 + $0x1c4] ss:$8 sps:$4 sm:$0xff]   ;;  %v2406_v39 = vld [vmem:[#allocation3 + $0x1c0] ss:$8 sps:$4 sm:$0xff]   ;;  %p2690_p3 = por %p2689_p2, %p2688_p1 }
  0x7d   : > { %2159 = vmatprep.subr.bf16.mxu1 %v2358_v41  ;;  %v2411_v40 = vld [vmem:[#allocation3 + $0x1b4] ss:$8 sps:$4 sm:$0xff]   ;;  %v2409_v41 = vld [vmem:[#allocation3 + $0x1b0] ss:$8 sps:$4 sm:$0xff]  }
  0x7e   : > { %p2691_p9 = pnand %p2690_p3, %p2684_p10 }
  0x7f   : > { %531 = vmatpush1.bf16.msra.mxu0 %v2323_v11 }
  0x80   : > { %532 = vmatprep.subr.bf16.mxu0 %v2324_v12  ;;  %2160 = vmatpush3.bf16.msra.mxu1 %v2359_v42  ;;  %v2414_v42 = vld [vmem:[#allocation3 + $0x1a4] ss:$8 sps:$4 sm:$0xff]  }
  0x81   : > { %2161 = vmatprep.subr.bf16.mxu1 %v2360_v43  ;;  %v2412_v43 = vld [vmem:[#allocation3 + $0x1a0] ss:$8 sps:$4 sm:$0xff]  }
  0x83   : > { %533 = vmatpush1.bf16.msra.mxu0 %v2326_v13  ;;  %v2373_v13 = vld [vmem:[#allocation3 + $0x170] ss:$8 sps:$4 sm:$0xff]  }
  0x84   : > { %534 = vmatprep.subr.bf16.mxu0 %v2327_v16  ;;  %2162 = vmatpush3.bf16.msra.mxu1 %v2361_v44  ;;  %v2415_v44 = vld [vmem:[#allocation3 + $0x190] ss:$8 sps:$4 sm:$0xff]  }
  0x85   : > { %2163 = vmatprep.subr.bf16.mxu1 %v2362_v45  ;;  %v2417_v45 = vld [vmem:[#allocation3 + $0x194] ss:$8 sps:$4 sm:$0xff]  }
  0x87   : > { %535 = vmatpush1.bf16.msra.mxu0 %v2329_v20  ;;  %v2381_v20 = vld [vmem:[#allocation3 + $0x154] ss:$8 sps:$4 sm:$0xff]  }
  0x88   : > { %536 = vmatprep.subr.bf16.mxu0 %v2330_v21  ;;  %2164 = vmatpush3.bf16.msra.mxu1 %v2363_v46  ;;  %v2379_v21 = vld [vmem:[#allocation3 + $0x150] ss:$8 sps:$4 sm:$0xff]   ;;  %v2420_v46 = vld [vmem:[#allocation3 + $0x184] ss:$8 sps:$4 sm:$0xff]  }
  0x89   : > { %2165 = vmatprep.subr.bf16.mxu1 %v2364_v47  ;;  %v2418_v47 = vld [vmem:[#allocation3 + $0x180] ss:$8 sps:$4 sm:$0xff]  }
  0x8b   : > { %537 = vmatpush2.bf16.msra.mxu0 %v2332_v22  ;;  %v2384_v22 = vld [vmem:[#allocation3 + $0x144] ss:$8 sps:$4 sm:$0xff]  }
  0x8c   : > { %538 = vmatprep.subr.bf16.mxu0 %v2333_v23  ;;  %2166 = vmatpush3.bf16.msra.mxu1 %v2365_v48  ;;  %v2382_v23 = vld [vmem:[#allocation3 + $0x140] ss:$8 sps:$4 sm:$0xff]   ;;  %v2983_v48 = vsub.s32 0, %v2967_v55 }
  0x8d   : > { %2167 = vmatprep.subr.bf16.mxu1 %v2366_v49 }
  0x8e   : > { %v343_v49 = vrot.slane %v2972_v57, %v2983_v48 }
  0x8f   : > { %539 = vmatpush2.bf16.msra.mxu0 %v2335_v24  ;;  %v2387_v24 = vld [vmem:[#allocation3 + $0x134] ss:$8 sps:$4 sm:$0xff]  }
  0x90   : > { %540 = vmatprep.subr.bf16.mxu0 %v2336_v25  ;;  %2168 = vmatpush3.bf16.msra.mxu1 %v2367_v50  ;;  %v2385_v25 = vld [vmem:[#allocation3 + $0x130] ss:$8 sps:$4 sm:$0xff]  }
  0x91   : > { %2169 = vmatprep.subr.bf16.mxu1 %v2368_v51 }
  0x93   : > { %541 = vmatpush2.bf16.msra.mxu0 %v2338_v26  ;;  %v2390_v26 = vld [vmem:[#allocation3 + $0x124] ss:$8 sps:$4 sm:$0xff]  }
  0x94   : > { %542 = vmatprep.subr.bf16.mxu0 %v2339_v27  ;;  %2170 = vmatpush3.bf16.msra.mxu1 %v2369_v52  ;;  %v2388_v27 = vld [vmem:[#allocation3 + $0x120] ss:$8 sps:$4 sm:$0xff]  }
  0x95   : > { %1023 = vmatprep.subr.bf16.mxu1 %v2375_v53 }
  0x97   : > { %543 = vmatpush2.bf16.msra.mxu0 %v2341_v28  ;;  %v2393_v28 = vld [vmem:[#allocation3 + $0x114] ss:$8 sps:$4 sm:$0xff]  }
  0x98   : > { %544 = vmatprep.subr.bf16.mxu0 %v2342_v29  ;;  %v2391_v29 = vld [vmem:[#allocation3 + $0x110] ss:$8 sps:$4 sm:$0xff]  }
  0x9b   : > { %545 = vmatpush2.bf16.msra.mxu0 %v2344_v30  ;;  %v2396_v30 = vld [vmem:[#allocation3 + $0x104] ss:$8 sps:$4 sm:$0xff]  }
  0x9c   : > { %546 = vmatprep.subr.bf16.mxu0 %v2345_v31  ;;  %v2394_v31 = vld [vmem:[#allocation3 + $0x100] ss:$8 sps:$4 sm:$0xff]  }
  0x9f   : > { %547 = vmatpush2.bf16.msra.mxu0 %v2347_v32  ;;  %v2399_v32 = vld [vmem:[#allocation3 + $0x1f4] ss:$8 sps:$4 sm:$0xff]  }
  0xa0   : > { %548 = vmatprep.subr.bf16.mxu0 %v2348_v33  ;;  %v2397_v33 = vld [vmem:[#allocation3 + $0x1f0] ss:$8 sps:$4 sm:$0xff]  }
  0xa3   : > { %549 = vmatpush2.bf16.msra.mxu0 %v2350_v34  ;;  %v2402_v34 = vld [vmem:[#allocation3 + $0x1e4] ss:$8 sps:$4 sm:$0xff]  }
  0xa4   : > { %550 = vmatprep.subr.bf16.mxu0 %v2351_v35  ;;  %v2400_v35 = vld [vmem:[#allocation3 + $0x1e0] ss:$8 sps:$4 sm:$0xff]  }
  0xa7   : > { %551 = vmatpush2.bf16.msra.mxu0 %v2353_v36  ;;  %v2405_v36 = vld [vmem:[#allocation3 + $0x1d4] ss:$8 sps:$4 sm:$0xff]  }
  0xaa   : > { %553 = vmatmul.mubr.bf16.vlgmr.msra.gmra.mxu0 %v2573_v19  ;;  %v2376_v19 = vld [vmem:[#allocation3 + $0x160] ss:$8 sps:$4 sm:$0xff]  }
 0x16a   : > { %v2976_v59 = vpop.f32.mrf.mxu0 }
 0x16b   : > { %v555_v50 = vadd.f32 %v2976_v59, %v343_v49 }
 0x16c   : > { %v556_v60 = vpop.f32.mrf.mxu0 }
 0x16d   : > { %v557_v61 = vadd.f32 %v556_v60, %v347_v58  ;;  %v1976_v51 = vmul.f32 -1.442695, %v555_v50  ;;  %v1982_v60 = vld [vmem:[%s3098_s3] ss:$0 sm:$0xff] }
 0x16e   : > { %v2978_v62 = vpop.f32.mrf.mxu0 }
 0x16f   : > { %v1978_v63 = vmul.f32 -1.442695, %v557_v61  ;;  %v559_v52 = vadd.f32 %v2978_v62, %v343_v49 }
 0x170   : > { %v560_v0 = vpop.f32.mrf.mxu0 }
 0x171   : > { %2513 = vpow2.f32 %v1978_v63  ;;  %v561_v1 = vadd.f32 %v560_v0, %v347_v58  ;;  %v1977_v53 = vmul.f32 -1.442695, %v559_v52 }
 0x173   : > { %v1979_v2 = vmul.f32 -1.442695, %v561_v1 }
 0x175   : > { %2515 = vpow2.f32 %v1979_v2 }
 0x17e   : > { %v2514_v3 = vpop.eup %2513 }
 0x17f   : > { %v581_v4 = vadd.f32 1.0, %v2514_v3 }
 0x181   : > { %2517 = vrcp.f32 %v581_v4 }
 0x182   : > { %v2516_v5 = vpop.eup %2515 }
 0x183   : > { %v582_v6 = vadd.f32 1.0, %v2516_v5 }
 0x185   : > { %2519 = vrcp.f32 %v582_v6 }
 0x186   : > { %2521 = vpow2.f32 %v1976_v51 }
 0x187   : > { %2523 = vpow2.f32 %v1977_v53 }
 0x18e   : > { %v2518_v7 = vpop.eup %2517 }
 0x18f   : > { %v587_v8 = vmul.f32 %v2518_v7, %v2957_v14 }
 0x191   : > { %v2133_v9 = vpack.c.bf16 %v587_v8, %v587_v8 }
 0x192   : > { %v2520_v10 = vpop.eup %2519 }
 0x193   : > { %597 = vst [vmem:[#allocation2 + $0x4] sm:$0xf] %v2133_v9  ;;  %v588_v11 = vmul.f32 %v2520_v10, %v2959_v15  ;;  %v2522_v58 = vpop.eup %2521 }
 0x194   : > { %v569_v0 = vadd.f32 1.0, %v2522_v58  ;;  %v2524_v57 = vpop.eup %2523 }
 0x195   : > { %v2134_v12 = vpack.c.bf16 %v588_v11, %v588_v11  ;;  %v570_v62 = vadd.f32 1.0, %v2524_v57  ;;  %v2449_v57 = vld [vmem:[#allocation3 + $0x250] ss:$8 sps:$4 sm:$0xff]  }
 0x197   : > { %598 = vst [vmem:[#allocation2 + $0xc] sm:$0xf] %v2134_v12 }
 0x19e   : > { %v2370_v16 = vld [vmem:[#allocation2 + $0x4] ss:$8 sps:$4 sm:$0xff]  }
 0x19f   : > { %778 = vmatprep.mubr.bf16.mxu1 %v2370_v16 }
 0x1a0   : > { %779 = vmatmul.mubr.bf16.vlgmr.msra.gmra.mxu1 %v2372_v17 }
 0x1a1   : > { %1024 = vmatpush1.bf16.msra.mxu1 %v2373_v13 }
 0x1a2   : > { %1025 = vmatprep.subr.bf16.mxu1 %v2378_v18 }
 0x1a5   : > { %1026 = vmatpush1.bf16.msra.mxu1 %v2376_v19  ;;  %v2423_v19 = vld [vmem:[#allocation2] ss:$8 sps:$4 sm:$0xff]  }
 0x1a6   : > { %1027 = vmatprep.subr.bf16.mxu1 %v2381_v20  ;;  %v2425_v20 = vld [vmem:[#allocation8 + $0xb8] sm:$0xff]  }
 0x1a9   : > { %1028 = vmatpush1.bf16.msra.mxu1 %v2379_v21  ;;  %v2426_v21 = vld [vmem:[#allocation8 + $0xf0] sm:$0xff]  }
 0x1aa   : > { %1029 = vmatprep.subr.bf16.mxu1 %v2384_v22  ;;  %v2427_v22 = vld [vmem:[#allocation8 + $0xb0] sm:$0xff]  }
 0x1ad   : > { %1030 = vmatpush1.bf16.msra.mxu1 %v2382_v23  ;;  %v2428_v23 = vld [vmem:[#allocation8 + $0xe8] sm:$0xff]  }
 0x1ae   : > { %1031 = vmatprep.subr.bf16.mxu1 %v2387_v24  ;;  %v2429_v24 = vld [vmem:[#allocation8 + $0xa8] sm:$0xff]  }
 0x1b1   : > { %1032 = vmatpush1.bf16.msra.mxu1 %v2385_v25  ;;  %v2431_v25 = vld [vmem:[#allocation8 + $0xa0] sm:$0xff]  }
 0x1b2   : > { %1033 = vmatprep.subr.bf16.mxu1 %v2390_v26  ;;  %v2432_v26 = vld [vmem:[#allocation8 + $0xd8] sm:$0xff]  }
 0x1b5   : > { %1034 = vmatpush1.bf16.msra.mxu1 %v2388_v27  ;;  %v2433_v27 = vld [vmem:[#allocation8 + $0x98] sm:$0xff]  }
 0x1b6   : > { %1035 = vmatprep.subr.bf16.mxu1 %v2393_v28  ;;  %v2434_v28 = vld [vmem:[#allocation8 + $0xd0] sm:$0xff]  }
 0x1b9   : > { %1036 = vmatpush1.bf16.msra.mxu1 %v2391_v29  ;;  %v2435_v29 = vld [vmem:[#allocation8 + $0x90] sm:$0xff]  }
 0x1ba   : > { %1037 = vmatprep.subr.bf16.mxu1 %v2396_v30  ;;  %v2436_v30 = vld [vmem:[#allocation8 + $0xc8] sm:$0xff]  }
 0x1bd   : > { %1038 = vmatpush1.bf16.msra.mxu1 %v2394_v31  ;;  %v2437_v31 = vld [vmem:[#allocation8 + $0x88] sm:$0xff]  }
 0x1be   : > { %1039 = vmatprep.subr.bf16.mxu1 %v2399_v32  ;;  %v2438_v32 = vld [vmem:[#allocation8 + $0xc0] sm:$0xff]  }
 0x1c1   : > { %1040 = vmatpush2.bf16.msra.mxu1 %v2397_v33  ;;  %v2439_v33 = vld [vmem:[#allocation8 + $0x80] sm:$0xff]  }
 0x1c2   : > { %1041 = vmatprep.subr.bf16.mxu1 %v2402_v34  ;;  %v2445_v34 = vld [vmem:[#allocation3 + $0x274] ss:$8 sps:$4 sm:$0xff]  }
 0x1c5   : > { %1042 = vmatpush2.bf16.msra.mxu1 %v2400_v35  ;;  %v3004_v35 = vld [vmem:[#allocation6 + $0x2] sm:$0x3] }
 0x1c6   : > { %1043 = vmatprep.subr.bf16.mxu1 %v2405_v36  ;;  %v850_v36 = vrot.slane %v3004_v35, %v2970_v56 }
 0x1c9   : > { %1044 = vmatpush2.bf16.msra.mxu1 %v2403_v37 }
 0x1ca   : > { %1045 = vmatprep.subr.bf16.mxu1 %v2408_v38 }
 0x1cd   : > { %1046 = vmatpush2.bf16.msra.mxu1 %v2406_v39 }
 0x1ce   : > { %1047 = vmatprep.subr.bf16.mxu1 %v2411_v40 }
 0x1d1   : > { %1048 = vmatpush2.bf16.msra.mxu1 %v2409_v41 }
 0x1d2   : > { %1049 = vmatprep.subr.bf16.mxu1 %v2414_v42 }
 0x1d5   : > { %1050 = vmatpush2.bf16.msra.mxu1 %v2412_v43 }
 0x1d6   : > { %1051 = vmatprep.subr.bf16.mxu1 %v2417_v45 }
 0x1d9   : > { %1052 = vmatpush2.bf16.msra.mxu1 %v2415_v44 }
 0x1da   : > { %1053 = vmatprep.subr.bf16.mxu1 %v2420_v46 }
 0x1dd   : > { %1054 = vmatpush2.bf16.msra.mxu1 %v2418_v47 }
 0x260   : > { %v2171_v54 = vpop.f32.mrf.mxu1 }
 0x262   : > { %v2172_v61 = vpop.f32.mrf.mxu1 }
 0x263   : > { %v2173_v55 = vadd.f32 %v2172_v61, %v2171_v54 }
 0x264   : > { %v2174_v63 = vpop.f32.mrf.mxu1 }
 0x265   : > { %v781_v1 = vadd.f32 %v2173_v55, %v1982_v60  ;;  %v2442_v55 = vld [vmem:[#allocation2] ss:$8 sps:$4 sm:$0xff]  }
 0x266   : > { %v2175_v2 = vpop.f32.mrf.mxu1 }
 0x267   : > { %2525 = vtanh.f32 %v781_v1  ;;  %v2176_v59 = vadd.f32 %v2175_v2, %v2174_v63  ;;  %v2448_v63 = vld [vmem:[#allocation3 + $0x264] ss:$8 sps:$4 sm:$0xff]   ;;  %v2451_v1 = vld [vmem:[#allocation3 + $0x254] ss:$8 sps:$4 sm:$0xff]  }
 0x268   : > { %2527 = vrcp.f32 %v569_v0  ;;  %v2446_v0 = vld [vmem:[#allocation3 + $0x260] ss:$8 sps:$4 sm:$0xff]   ;;  %v2454_v2 = vld [vmem:[#allocation3 + $0x244] ss:$8 sps:$4 sm:$0xff]  }
 0x269   : > { %v784_v3 = vadd.f32 %v2176_v59, %v1982_v60  ;;  %v2443_v60 = vld [vmem:[#allocation3 + $0x270] ss:$8 sps:$4 sm:$0xff]   ;;  %v2452_v59 = vld [vmem:[#allocation3 + $0x240] ss:$8 sps:$4 sm:$0xff]  }
 0x26b   : > { %2529 = vtanh.f32 %v784_v3  ;;  %v2455_v3 = vld [vmem:[#allocation3 + $0x230] ss:$8 sps:$4 sm:$0xff]  }
 0x26c   : > { %2531 = vrcp.f32 %v570_v62  ;;  %v2457_v62 = vld [vmem:[#allocation3 + $0x234] ss:$8 sps:$4 sm:$0xff]  }
 0x274   : > { %v2526_v4 = vpop.eup %2525 }
 0x275   : > { %v789_v5 = vsub.f32 %v2526_v4, %v2957_v14  ;;  %v2528_v6 = vpop.eup %2527  ;;  %v2460_v4 = vld [vmem:[#allocation3 + $0x224] ss:$8 sps:$4 sm:$0xff]  }
 0x277   : > { %v791_v7 = vmul.f32 %v2528_v6, %v789_v5  ;;  %v2458_v5 = vld [vmem:[#allocation3 + $0x220] ss:$8 sps:$4 sm:$0xff]   ;;  %v2463_v6 = vld [vmem:[#allocation3 + $0x214] ss:$8 sps:$4 sm:$0xff]  }
 0x278   : > { %v2530_v8 = vpop.eup %2529 }
 0x279   : > { %v2994_v9 = vadd.f32 %v791_v7, %v2957_v14  ;;  %v790_v10 = vsub.f32 %v2530_v8, %v2959_v15  ;;  %v2532_v11 = vpop.eup %2531  ;;  %v2424_v14 = vld [vmem:[#allocation8 + $0xf8] sm:$0xff]   ;;  %v2461_v7 = vld [vmem:[#allocation3 + $0x210] ss:$8 sps:$4 sm:$0xff]  }
 0x27a   : > { %2177 = vmatprep.subr.bf16.mxu0 %v2424_v14  ;;  %v2466_v8 = vld [vmem:[#allocation3 + $0x204] ss:$8 sps:$4 sm:$0xff]  }
 0x27b   : > { %v2135_v12 = vpack.c.bf16 %v2994_v9, %v2994_v9  ;;  %v792_v13 = vmul.f32 %v2532_v11, %v790_v10  ;;  %2178 = vmatpush3.bf16.msra.mxu0 %v2425_v20  ;;  %v2464_v10 = vld [vmem:[#allocation3 + $0x200] ss:$8 sps:$4 sm:$0xff]   ;;  %v2469_v11 = vld [vmem:[#allocation3 + $0x2f4] ss:$8 sps:$4 sm:$0xff]   ;;  %v2478_v14 = vld [vmem:[#allocation3 + $0x2c4] ss:$8 sps:$4 sm:$0xff]  }
 0x27c   : > { %2179 = vmatprep.subr.bf16.mxu0 %v2426_v21  ;;  %v2476_v20 = vld [vmem:[#allocation3 + $0x2c0] ss:$8 sps:$4 sm:$0xff]   ;;  %v2481_v21 = vld [vmem:[#allocation3 + $0x2b4] ss:$8 sps:$4 sm:$0xff]  }
 0x27d   : > { %803 = vst [vmem:[#allocation2 + $0x4] sm:$0xf] %v2135_v12  ;;  %v3000_v16 = vadd.f32 %v792_v13, %v2959_v15  ;;  %v2430_v15 = vld [vmem:[#allocation8 + $0xe0] sm:$0xff]   ;;  %v2467_v12 = vld [vmem:[#allocation3 + $0x2f0] ss:$8 sps:$4 sm:$0xff]  }
 0x27e   : > { %v2472_v13 = vld [vmem:[#allocation3 + $0x2e4] ss:$8 sps:$4 sm:$0xff]  }
 0x27f   : > { %v2136_v17 = vpack.c.bf16 %v3000_v16, %v3000_v16  ;;  %2180 = vmatpush3.bf16.msra.mxu0 %v2427_v22  ;;  %v2479_v22 = vld [vmem:[#allocation3 + $0x2b0] ss:$8 sps:$4 sm:$0xff]  }
 0x280   : > { %2181 = vmatprep.subr.bf16.mxu0 %v2428_v23  ;;  %v2484_v23 = vld [vmem:[#allocation3 + $0x2a4] ss:$8 sps:$4 sm:$0xff]  }
 0x281   : > { %804 = vst [vmem:[#allocation2 + $0xc] sm:$0xf] %v2136_v17  ;;  %v2470_v17 = vld [vmem:[#allocation3 + $0x2e0] ss:$8 sps:$4 sm:$0xff]  }
 0x283   : > { %2182 = vmatpush3.bf16.msra.mxu0 %v2429_v24  ;;  %v2482_v24 = vld [vmem:[#allocation3 + $0x2a0] ss:$8 sps:$4 sm:$0xff]  }
 0x284   : > { %2183 = vmatprep.subr.bf16.mxu0 %v2430_v15  ;;  %v2485_v15 = vld [vmem:[#allocation3 + $0x290] ss:$8 sps:$4 sm:$0xff]  }
 0x287   : > { %2184 = vmatpush3.bf16.msra.mxu0 %v2431_v25  ;;  %v2487_v25 = vld [vmem:[#allocation3 + $0x294] ss:$8 sps:$4 sm:$0xff]  }
 0x288   : > { %v2421_v18 = vld [vmem:[#allocation2 + $0x4] ss:$8 sps:$4 sm:$0xff]   ;;  %2185 = vmatprep.subr.bf16.mxu0 %v2432_v26  ;;  %v2490_v26 = vld [vmem:[#allocation3 + $0x284] ss:$8 sps:$4 sm:$0xff]  }
 0x289   : > { %1055 = vmatprep.mubr.bf16.mxu1 %v2421_v18  ;;  %v2475_v18 = vld [vmem:[#allocation3 + $0x2d4] ss:$8 sps:$4 sm:$0xff]  }
 0x28a   : > { %1056 = vmatmul.mubr.bf16.vlgmr.msra.gmra.mxu1 %v2423_v19  ;;  %v2473_v19 = vld [vmem:[#allocation3 + $0x2d0] ss:$8 sps:$4 sm:$0xff]  }
 0x28b   : > { %2186 = vmatpush3.bf16.msra.mxu0 %v2433_v27  ;;  %v2488_v27 = vld [vmem:[#allocation3 + $0x280] ss:$8 sps:$4 sm:$0xff]  }
 0x28c   : > { %2187 = vmatprep.subr.bf16.mxu0 %v2434_v28  ;;  %v846_v28 = vrot.slane %v3004_v35, %v2983_v48 }
 0x28f   : > { %2188 = vmatpush3.bf16.msra.mxu0 %v2435_v29 }
 0x290   : > { %2189 = vmatprep.subr.bf16.mxu0 %v2436_v30 }
 0x293   : > { %2190 = vmatpush3.bf16.msra.mxu0 %v2437_v31 }
 0x294   : > { %2191 = vmatprep.subr.bf16.mxu0 %v2438_v32 }
 0x297   : > { %2192 = vmatpush3.bf16.msra.mxu0 %v2439_v33 }
 0x298   : > { %1528 = vmatprep.subr.bf16.mxu0 %v2445_v34 }
 0x34a   : > { %v3008_v37 = vpop.f32.mrf.mxu1 }
 0x34b   : > { %v1058_v29 = vadd.f32 %v3008_v37, %v846_v28 }
 0x34c   : > { %v1059_v38 = vpop.f32.mrf.mxu1 }
 0x34d   : > { %v1060_v39 = vadd.f32 %v1059_v38, %v850_v36  ;;  %v2037_v30 = vmul.f32 -1.442695, %v1058_v29 }
 0x34e   : > { %v3010_v40 = vpop.f32.mrf.mxu1 }
 0x34f   : > { %v2039_v41 = vmul.f32 -1.442695, %v1060_v39  ;;  %v1062_v31 = vadd.f32 %v3010_v40, %v846_v28 }
 0x350   : > { %v1063_v42 = vpop.f32.mrf.mxu1 }
 0x351   : > { %2533 = vpow2.f32 %v2039_v41  ;;  %v1064_v43 = vadd.f32 %v1063_v42, %v850_v36  ;;  %v2038_v32 = vmul.f32 -1.442695, %v1062_v31  ;;  %v2044_v36 = vld [vmem:[%s3098_s3 + $0x1] ss:$0 sm:$0xff] }
 0x353   : > { %v2040_v44 = vmul.f32 -1.442695, %v1064_v43 }
 0x355   : > { %2535 = vpow2.f32 %v2040_v44 }
 0x35e   : > { %v2534_v45 = vpop.eup %2533 }
 0x35f   : > { %v1084_v46 = vadd.f32 1.0, %v2534_v45 }
 0x361   : > { %2537 = vrcp.f32 %v1084_v46 }
 0x362   : > { %v2536_v47 = vpop.eup %2535 }
 0x363   : > { %v1085_v49 = vadd.f32 1.0, %v2536_v47 }
 0x365   : > { %2539 = vrcp.f32 %v1085_v49 }
 0x366   : > { %2541 = vpow2.f32 %v2037_v30 }
 0x367   : > { %2543 = vpow2.f32 %v2038_v32 }
 0x36e   : > { %v2538_v50 = vpop.eup %2537 }
 0x36f   : > { %v1090_v51 = vmul.f32 %v2538_v50, %v2994_v9 }
 0x371   : > { %v2137_v52 = vpack.c.bf16 %v1090_v51, %v1090_v51 }
 0x372   : > { %v2540_v53 = vpop.eup %2539 }
 0x373   : > { %1100 = vst [vmem:[#allocation2 + $0x4] sm:$0xf] %v2137_v52  ;;  %v1091_v54 = vmul.f32 %v2540_v53, %v3000_v16  ;;  %v2542_v34 = vpop.eup %2541 }
 0x374   : > { %v1072_v42 = vadd.f32 1.0, %v2542_v34  ;;  %v2544_v35 = vpop.eup %2543 }
 0x375   : > { %v2138_v58 = vpack.c.bf16 %v1091_v54, %v1091_v54  ;;  %v1073_v40 = vadd.f32 1.0, %v2544_v35 }
 0x377   : > { %1101 = vst [vmem:[#allocation2 + $0xc] sm:$0xf] %v2138_v58 }
 0x37e   : > { %v2440_v61 = vld [vmem:[#allocation2 + $0x4] ss:$8 sps:$4 sm:$0xff]  }
 0x37f   : > { %1283 = vmatprep.mubr.bf16.mxu0 %v2440_v61 }
 0x380   : > { %1284 = vmatmul.mubr.bf16.vlgmr.msra.gmra.mxu0 %v2442_v55 }
 0x381   : > { %1529 = vmatpush1.bf16.msra.mxu0 %v2443_v60 }
 0x382   : > { %1530 = vmatprep.subr.bf16.mxu0 %v2448_v63 }
 0x385   : > { %1531 = vmatpush1.bf16.msra.mxu0 %v2446_v0  ;;  %v2493_v0 = vld [vmem:[#allocation2] ss:$8 sps:$4 sm:$0xff]  }
 0x386   : > { %1532 = vmatprep.subr.bf16.mxu0 %v2451_v1  ;;  %v2495_v1 = vld [vmem:[#allocation8 + $0x138] sm:$0xff]  }
 0x389   : > { %1533 = vmatpush1.bf16.msra.mxu0 %v2449_v57  ;;  %v2496_v57 = vld [vmem:[#allocation8 + $0x170] sm:$0xff]  }
 0x38a   : > { %1534 = vmatprep.subr.bf16.mxu0 %v2454_v2  ;;  %v2497_v2 = vld [vmem:[#allocation8 + $0x130] sm:$0xff]  }
 0x38d   : > { %1535 = vmatpush1.bf16.msra.mxu0 %v2452_v59  ;;  %v2498_v59 = vld [vmem:[#allocation8 + $0x168] sm:$0xff]  }
 0x38e   : > { %1536 = vmatprep.subr.bf16.mxu0 %v2457_v62  ;;  %v2499_v62 = vld [vmem:[#allocation8 + $0x128] sm:$0xff]  }
 0x391   : > { %1537 = vmatpush1.bf16.msra.mxu0 %v2455_v3  ;;  %v2501_v3 = vld [vmem:[#allocation8 + $0x120] sm:$0xff]  }
 0x392   : > { %1538 = vmatprep.subr.bf16.mxu0 %v2460_v4  ;;  %v2502_v4 = vld [vmem:[#allocation8 + $0x158] sm:$0xff]  }
 0x395   : > { %1539 = vmatpush1.bf16.msra.mxu0 %v2458_v5  ;;  %v2503_v5 = vld [vmem:[#allocation8 + $0x118] sm:$0xff]  }
 0x396   : > { %1540 = vmatprep.subr.bf16.mxu0 %v2463_v6  ;;  %v2504_v6 = vld [vmem:[#allocation8 + $0x150] sm:$0xff]  }
 0x399   : > { %1541 = vmatpush1.bf16.msra.mxu0 %v2461_v7  ;;  %v2505_v7 = vld [vmem:[#allocation8 + $0x110] sm:$0xff]  }
 0x39a   : > { %1542 = vmatprep.subr.bf16.mxu0 %v2466_v8  ;;  %v2506_v8 = vld [vmem:[#allocation8 + $0x148] sm:$0xff]  }
 0x39d   : > { %1543 = vmatpush1.bf16.msra.mxu0 %v2464_v10  ;;  %v2507_v10 = vld [vmem:[#allocation8 + $0x108] sm:$0xff]  }
 0x39e   : > { %1544 = vmatprep.subr.bf16.mxu0 %v2469_v11  ;;  %v2508_v11 = vld [vmem:[#allocation8 + $0x140] sm:$0xff]  }
 0x3a1   : > { %1545 = vmatpush2.bf16.msra.mxu0 %v2467_v12  ;;  %v2509_v12 = vld [vmem:[#allocation8 + $0x100] sm:$0xff]  }
 0x3a2   : > { %1546 = vmatprep.subr.bf16.mxu0 %v2472_v13  ;;  %v1346_v13 = vld [vmem:[#allocation6 + $0x4] sm:$0x3] }
 0x3a5   : > { %1547 = vmatpush2.bf16.msra.mxu0 %v2470_v17  ;;  %v1355_v17 = vrot.slane %v1346_v13, %v2970_v56 }
 0x3a6   : > { %1548 = vmatprep.subr.bf16.mxu0 %v2475_v18 }
 0x3a9   : > { %1549 = vmatpush2.bf16.msra.mxu0 %v2473_v19 }
 0x3aa   : > { %1550 = vmatprep.subr.bf16.mxu0 %v2478_v14 }
 0x3ad   : > { %1551 = vmatpush2.bf16.msra.mxu0 %v2476_v20 }
 0x3ae   : > { %1552 = vmatprep.subr.bf16.mxu0 %v2481_v21 }
 0x3b1   : > { %1553 = vmatpush2.bf16.msra.mxu0 %v2479_v22 }
 0x3b2   : > { %1554 = vmatprep.subr.bf16.mxu0 %v2484_v23 }
 0x3b5   : > { %1555 = vmatpush2.bf16.msra.mxu0 %v2482_v24 }
 0x3b6   : > { %1556 = vmatprep.subr.bf16.mxu0 %v2487_v25 }
 0x3b9   : > { %1557 = vmatpush2.bf16.msra.mxu0 %v2485_v15 }
 0x3ba   : > { %1558 = vmatprep.subr.bf16.mxu0 %v2490_v26 }
 0x3bd   : > { %1559 = vmatpush2.bf16.msra.mxu0 %v2488_v27 }
 0x440   : > { %v2193_v33 = vpop.f32.mrf.mxu0 }
 0x442   : > { %v2194_v38 = vpop.f32.mrf.mxu0 }
 0x443   : > { %v2195_v39 = vadd.f32 %v2194_v38, %v2193_v33  ;;  %v2510_v33 = vld [vmem:[#allocation2] ss:$8 sps:$4 sm:$0xff]  }
 0x444   : > { %v2196_v41 = vpop.f32.mrf.mxu0 }
 0x445   : > { %v1286_v43 = vadd.f32 %v2195_v39, %v2044_v36 }
 0x446   : > { %v2197_v44 = vpop.f32.mrf.mxu0 }
 0x447   : > { %2545 = vtanh.f32 %v1286_v43  ;;  %v2198_v37 = vadd.f32 %v2197_v44, %v2196_v41  ;;  %v2106_v44 = vld [vmem:[%s3098_s3 + $0x2] ss:$0 sm:$0xff] }
 0x448   : > { %2547 = vrcp.f32 %v1072_v42 }
 0x449   : > { %v1289_v45 = vadd.f32 %v2198_v37, %v2044_v36  ;;  %v1351_v36 = vrot.slane %v1346_v13, %v2983_v48 }
 0x44b   : > { %2549 = vtanh.f32 %v1289_v45 }
 0x44c   : > { %2551 = vrcp.f32 %v1073_v40 }
 0x454   : > { %v2546_v46 = vpop.eup %2545 }
 0x455   : > { %v1294_v47 = vsub.f32 %v2546_v46, %v2994_v9  ;;  %v2548_v49 = vpop.eup %2547 }
 0x457   : > { %v1296_v50 = vmul.f32 %v2548_v49, %v1294_v47 }
 0x458   : > { %v2550_v51 = vpop.eup %2549 }
 0x459   : > { %v3023_v52 = vadd.f32 %v1296_v50, %v2994_v9  ;;  %v1295_v53 = vsub.f32 %v2550_v51, %v3000_v16  ;;  %v2552_v54 = vpop.eup %2551  ;;  %v2494_v9 = vld [vmem:[#allocation8 + $0x178] sm:$0xff]  }
 0x45a   : > { %2199 = vmatprep.subr.bf16.mxu1 %v2494_v9 }
 0x45b   : > { %v2139_v58 = vpack.c.bf16 %v3023_v52, %v3023_v52  ;;  %v1297_v60 = vmul.f32 %v2552_v54, %v1295_v53  ;;  %2200 = vmatpush3.bf16.msra.mxu1 %v2495_v1 }
 0x45c   : > { %2201 = vmatprep.subr.bf16.mxu1 %v2496_v57 }
 0x45d   : > { %1308 = vst [vmem:[#allocation2 + $0x4] sm:$0xf] %v2139_v58  ;;  %v3029_v61 = vadd.f32 %v1297_v60, %v3000_v16  ;;  %v2500_v16 = vld [vmem:[#allocation8 + $0x160] sm:$0xff]  }
 0x45f   : > { %v2140_v55 = vpack.c.bf16 %v3029_v61, %v3029_v61  ;;  %2202 = vmatpush3.bf16.msra.mxu1 %v2497_v2 }
 0x460   : > { %2203 = vmatprep.subr.bf16.mxu1 %v2498_v59 }
 0x461   : > { %1309 = vst [vmem:[#allocation2 + $0xc] sm:$0xf] %v2140_v55 }
 0x463   : > { %2204 = vmatpush3.bf16.msra.mxu1 %v2499_v62 }
 0x464   : > { %2205 = vmatprep.subr.bf16.mxu1 %v2500_v16 }
 0x467   : > { %2206 = vmatpush3.bf16.msra.mxu1 %v2501_v3 }
 0x468   : > { %v2491_v63 = vld [vmem:[#allocation2 + $0x4] ss:$8 sps:$4 sm:$0xff]   ;;  %2207 = vmatprep.subr.bf16.mxu1 %v2502_v4 }
 0x469   : > { %1560 = vmatprep.mubr.bf16.mxu0 %v2491_v63 }
 0x46a   : > { %1561 = vmatmul.mubr.bf16.vlgmr.msra.gmra.mxu0 %v2493_v0 }
 0x46b   : > { %2208 = vmatpush3.bf16.msra.mxu1 %v2503_v5 }
 0x46c   : > { %2209 = vmatprep.subr.bf16.mxu1 %v2504_v6 }
 0x46f   : > { %2210 = vmatpush3.bf16.msra.mxu1 %v2505_v7 }
 0x470   : > { %2211 = vmatprep.subr.bf16.mxu1 %v2506_v8 }
 0x473   : > { %2212 = vmatpush3.bf16.msra.mxu1 %v2507_v10 }
 0x474   : > { %2213 = vmatprep.subr.bf16.mxu1 %v2508_v11 }
 0x477   : > { %2214 = vmatpush3.bf16.msra.mxu1 %v2509_v12 }
 0x52a   : > { %v1562_v18 = vpop.f32.mrf.mxu0 }
 0x52b   : > { %v1563_v38 = vadd.f32 %v1562_v18, %v1351_v36 }
 0x52c   : > { %v1564_v19 = vpop.f32.mrf.mxu0 }
 0x52d   : > { %v1565_v14 = vadd.f32 %v1564_v19, %v1355_v17  ;;  %v2099_v39 = vmul.f32 -1.442695, %v1563_v38 }
 0x52e   : > { %v1566_v20 = vpop.f32.mrf.mxu0 }
 0x52f   : > { %v2101_v21 = vmul.f32 -1.442695, %v1565_v14  ;;  %v1567_v41 = vadd.f32 %v1566_v20, %v1351_v36 }
 0x530   : > { %v1568_v22 = vpop.f32.mrf.mxu0 }
 0x531   : > { %2553 = vpow2.f32 %v2101_v21  ;;  %v1569_v23 = vadd.f32 %v1568_v22, %v1355_v17  ;;  %v2100_v42 = vmul.f32 -1.442695, %v1567_v41 }
 0x533   : > { %v2102_v24 = vmul.f32 -1.442695, %v1569_v23 }
 0x535   : > { %2555 = vpow2.f32 %v2102_v24 }
 0x53e   : > { %v2554_v15 = vpop.eup %2553 }
 0x53f   : > { %v1589_v25 = vadd.f32 1.0, %v2554_v15 }
 0x541   : > { %2557 = vrcp.f32 %v1589_v25 }
 0x542   : > { %v2556_v26 = vpop.eup %2555 }
 0x543   : > { %v1590_v27 = vadd.f32 1.0, %v2556_v26 }
 0x545   : > { %2559 = vrcp.f32 %v1590_v27 }
 0x546   : > { %2561 = vpow2.f32 %v2099_v39 }
 0x547   : > { %2563 = vpow2.f32 %v2100_v42 }
 0x54e   : > { %v2558_v28 = vpop.eup %2557 }
 0x54f   : > { %v1595_v29 = vmul.f32 %v2558_v28, %v3023_v52 }
 0x551   : > { %v2141_v56 = vpack.c.bf16 %v1595_v29, %v1595_v29 }
 0x552   : > { %v2560_v30 = vpop.eup %2559 }
 0x553   : > { %1605 = vst [vmem:[#allocation2 + $0x4] sm:$0xf] %v2141_v56  ;;  %v1596_v31 = vmul.f32 %v2560_v30, %v3029_v61  ;;  %v2562_v35 = vpop.eup %2561 }
 0x554   : > { %v1577_v46 = vadd.f32 1.0, %v2562_v35  ;;  %v2564_v49 = vpop.eup %2563 }
 0x555   : > { %v2142_v32 = vpack.c.bf16 %v1596_v31, %v1596_v31  ;;  %v1578_v51 = vadd.f32 1.0, %v2564_v49 }
 0x557   : > { %1606 = vst [vmem:[#allocation2 + $0xc] sm:$0xf] %v2142_v32 }
 0x55e   : > { %v2512_v34 = vld [vmem:[#allocation2 + $0x4] ss:$8 sps:$4 sm:$0xff]  }
 0x55f   : > { %1788 = vmatprep.mubr.bf16.mxu1 %v2512_v34 }
 0x560   : > { %1789 = vmatmul.mubr.bf16.vlgmr.msra.gmra.mxu1 %v2510_v33 }
 0x620   : > { %v2215_v43 = vpop.f32.mrf.mxu1 }
 0x622   : > { %v2216_v37 = vpop.f32.mrf.mxu1 }
 0x623   : > { %v2217_v40 = vadd.f32 %v2216_v37, %v2215_v43 }
 0x624   : > { %v2218_v45 = vpop.f32.mrf.mxu1 }
 0x625   : > { %v1791_v47 = vadd.f32 %v2217_v40, %v2106_v44 }
 0x626   : > { %v2219_v48 = vpop.f32.mrf.mxu1 }
 0x627   : > { %2565 = vtanh.f32 %v1791_v47  ;;  %v2220_v50 = vadd.f32 %v2219_v48, %v2218_v45 }
 0x628   : > { %2567 = vrcp.f32 %v1577_v46 }
 0x629   : > { %v1794_v53 = vadd.f32 %v2220_v50, %v2106_v44 }
 0x62b   : > { %2569 = vtanh.f32 %v1794_v53 }
 0x62c   : > { %2571 = vrcp.f32 %v1578_v51 }
 0x634   : > { %v2566_v54 = vpop.eup %2565 }
 0x635   : > { %v1799_v58 = vsub.f32 %v2566_v54, %v3023_v52  ;;  %v2568_v60 = vpop.eup %2567 }
 0x637   : > { %v1801_v55 = vmul.f32 %v2568_v60, %v1799_v58 }
 0x638   : > { %v2570_v63 = vpop.eup %2569 }
 0x639   : > { %v1800_v0 = vsub.f32 %v2570_v63, %v3029_v61  ;;  %v1803_v9 = vadd.f32 %v1801_v55, %v3023_v52  ;;  %v2572_v1 = vpop.eup %2571 }
 0x63b   : > { %v1802_v57 = vmul.f32 %v2572_v1, %v1800_v0  ;;  %1805 = vst [vmem:[%s286_s23] sm:$0xff] %v1803_v9 }
 0x63d   : > { %v1804_v2 = vadd.f32 %v1802_v57, %v3029_v61 }
 0x63f   : > { %1806 = vst [vmem:[%s286_s23 + $0x8] sm:$0xff] %v1804_v2 }
 0x640   : > { %2694 = shalt.err (!%p2691_p9)
}
 0x641   : > { %s2695_s30 = scalar_lea.hbm %s3049_s9, 256  ;;  %s2699_s15 = scalar_lea.hbm %s3100_s5, 512 }
 0x642   : > { %p2696_p7 = scmp.ne.s32.totalorder %s3049_s9, %s2695_s30  ;;  %p2700_p4 = scmp.lt.s32.totalorder %s3049_s9, %s3100_s5 }
 0x643   : > { %p2701_p8 = scmp.lt.s32.totalorder %s2699_s15, %s2695_s30 }
 0x644   : > { %p2697_p13 = pnand %p2696_p7, %p3120_p0 }
 0x645   : > { %p2702_p6 = por %p2701_p8, %p2700_p4 }
 0x646   : > { %p2698_p12 = pneg %p2697_p13 }
 0x648   : > { %p2703_p11 = pnand %p2702_p6, %p2698_p12 }
 0x64a   : > { %2706 = shalt.err (!%p2703_p11)
}
 0x64b   : > { %s2766_s23 = smov 128   ;;  %s2767_s28 = smov 8  }
 0x64c   : > { %2235 = dma.vmem_to_hbm [thread:$0]  (%p3120_p0), %s3051_s29, 256, %s3049_s9, %s1808_s22, %s2766_s23, %s2766_s23, %s2767_s28  }
 0x64d PF: > { %s1836_s10 = sand.u32 1, %s2741_s18   ;;  %p3121_p5 = scmp.ne.s32.totalorder %s3107_s25, 0 }
 0x64e   : > { %p3122_p10 = scmp.ge.s32.totalorder %s2753_s21, 2  ;;  %s1837_s14 = scalar_lea.sflag [#allocation5], %s1836_s10 }
 0x650   : > { %p2252_p1 = pnand %p3122_p10, %p3121_p5 }
 0x652   : > { %p2253_p2 = pneg %p2252_p1 }
 0x654   : > { %2736 = dma.done.wait (%p2253_p2), %s1837_s14, 256  }
 0x655   : > { %2738 = vsyncadd (%p2253_p2), %s1837_s14, 4294967040  ;;  %p20_p3 = scmp.ge.s32.totalorder %s2881_s8, 4   ;;  %s3123_s18 = smov %s2745_s19 }
 0x656   : > { %s3124_s19 = smov %s2749_s20  ;;  %s3125_s20 = smov %s2891_s11 }
 0x657   : > { %s3126_s21 = smov %s2881_s8  ;;  %22 = sbr.rel (!%p20_p3) target bundleno = 7 (0x7), region = 106 }
 0x65c   :  { %1842 = vsyncpa [#allocation4], 1 }
 0x65d   :  { %1844 = vsyncpa [#allocation4 + $0x1], 1 }
 0x65e   :  { %1845 = vsyncpa [#allocation7], 1 }
 0x65f   :  { %1846 = vsyncpa [#allocation10], 1 }
 0x660   :  { %1848 = vsyncpa [#allocation10 + $0x1], 1 }
 0x661   :  { %1849 = vsyncpa [#allocation5], 1 }
 0x662   :  { %1851 = vsyncpa [#allocation5 + $0x1], 1 }

// kernel: tpu_custom_call.1
= control target key start
LH: loop header
LB: loop body
LE: loop exit
PB: predicated region body
PF: predicated region fallthrough
CT: control target
= control target key end

     0   :  { %10 = vsyncpa [#allocation4], 0  ;;  %s3095_s0 = inlined_call_operand.hbm [shape: bf16[3,256,256], index: 0, kind: input, shape index: {}]   ;;  %s3096_s1 = inlined_call_operand.hbm [shape: f32[3,1,256], index: 1, kind: input, shape index: {}]   ;;  %s3097_s2 = inlined_call_operand.hbm [shape: bf16[3,256,128], index: 2, kind: input, shape index: {}]   ;;  %s3098_s3 = inlined_call_operand.vmem [shape: f32[3,1,128], index: 3, kind: input, shape index: {}]   ;;  %s3099_s4 = inlined_call_operand.hbm [shape: f32[32,128], index: 4, kind: input, shape index: {}]   ;;  %s3100_s5 = inlined_call_operand.hbm [shape: f32[32,128], index: 5, kind: output, shape index: {}]  }
   0x1   :  { %11 = vsyncpa [#allocation7], 0 }
   0x2   :  { %12 = vsyncpa [#allocation10], 0 }
   0x3   :  { %14 = vsyncpa [#allocation10 + $0x1], 0 }
   0x4   :  { %15 = vsyncpa [#allocation5], 0 }
   0x5   :  { %17 = vsyncpa [#allocation5 + $0x1], 0  ;;  %s2798_s18 = smov 0   ;;  %s2800_s19 = smov 0  }
   0x6   :  { %s2802_s20 = smov 0   ;;  %s2804_s21 = smov 0  }
   0x7 LB: > { %s2819_s22 = sadd.s32 4294967295, %s2753_s21   ;;  %s1925_s23 = sadd.s32 4294967294, %s2753_s21   ;;  %s2753_s21 = sphi %s2804_s21, %s3126_s21   ;;  %s2749_s20 = sphi %s2802_s20, %s3125_s20   ;;  %s2745_s19 = sphi %s2800_s19, %s3124_s19   ;;  %s2741_s18 = sphi %s2798_s18, %s3123_s18  }
   0x8   : > { %p127_p0 = scmp.ne.s32.totalorder %s2745_s19, %s2741_s18  ;;  %p3101_p1 = scmp.eq.s32.totalorder %s2819_s22, 0 }
   0x9   : > { %p157_p3 = scmp.eq.s32.totalorder %s1925_s23, 1  ;;  %p1926_p5 = scmp.ge.s32.totalorder %s2753_s21, 1 }
   0xa   : > { %p2828_p4 = por %p3101_p1, %p127_p0  ;;  %p164_p7 = scmp.lt.s32.totalorder %s2753_s21, 3 }
   0xb   : > { %p2833_p6 = por %p157_p3, %p127_p0  ;;  %s2755_s27 = smov [#allocation6]  }
   0xc   : > { %s3106_s24 = scalar_select %p2828_p4, 1, 0 }
   0xd   : > { %s3107_s25 = scalar_select %p2833_p6, 1, 0 }
   0xe   : > { %p2838_p8 = pnand %p1926_p5, %p164_p7  ;;  %s189_s28 = sshll.u32 %s2755_s27, 4  ;;  %s190_s28 = int_to_ptr.vmem [resolvable:$true] %s189_s28 }
   0xf   : > { %s2756_s30 = smov [#allocation3]   ;;  %s2586_s7 = scalar_lea.vmem %s190_s28, 96 }
  0x10   : > { %s3108_s26 = scalar_select %p2838_p8, 1, 0 }
  0x11   : > { %p2237_p9 = pneg %p2838_p8  ;;  %s176_s6 = sshll.u32 %s2756_s30, 4  ;;  %s177_s6 = int_to_ptr.vmem [resolvable:$true] %s176_s6 }
  0x12   : > { %p2587_p13 = scmp.ne.s32.totalorder %s190_s28, %s2586_s7  ;;  %p2594_p5 = scmp.lt.s32.totalorder %s190_s28, %s190_s28 }
  0x13   : > { %p2847_p11 = pnand %p2237_p9, %p3101_p1  ;;  %p2595_p7 = scmp.lt.s32.totalorder %s2586_s7, %s2586_s7 }
  0x15   : > { %p2577_p12 = pneg %p2847_p11  ;;  %p2596_p10 = por %p2595_p7, %p2594_p5 }
  0x17   : > { %p2589_p0 = pnand %p2587_p13, %p2577_p12 }
  0x19   : > { %p2590_p3 = pneg %p2589_p0 }
  0x1b   : > { %p2597_p9 = pnand %p2596_p10, %p2590_p3 }
  0x1d   : > { %2600 = shalt.err (!%p2597_p9)
}
  0x1e   : > { %s2757_s8 = smov 32   ;;  %s2758_s9 = smov 2  }
  0x1f   : > { %2243 = dma.hbm_to_vmem [thread:$0]  (!%p2847_p11), %s3096_s1, 96, %s190_s28, [#allocation7], %s2757_s8, %s2757_s8, %s2758_s9  }
  0x20   : > { %s2612_s12 = scalar_lea.vmem %s177_s6, 12288  ;;  %p2620_p2 = scmp.lt.s32.totalorder %s177_s6, %s177_s6 }
  0x21   : > { %p2613_p1 = scmp.ne.s32.totalorder %s177_s6, %s2612_s12  ;;  %p2621_p6 = scmp.lt.s32.totalorder %s2612_s12, %s2612_s12 }
  0x23   : > { %p2615_p13 = pnand %p2613_p1, %p2577_p12  ;;  %p2622_p5 = por %p2621_p6, %p2620_p2 }
  0x25   : > { %p2616_p0 = pneg %p2615_p13 }
  0x27   : > { %p2623_p10 = pnand %p2622_p5, %p2616_p0 }
  0x29   : > { %2626 = shalt.err (!%p2623_p10)
}
  0x2a   : > { %s3102_s13 = smov 128   ;;  %s2760_s14 = smov 8  }
  0x2b   : > { %2240 = dma.hbm_to_vmem [thread:$0]  (!%p2847_p11), %s3095_s0, 12288, %s177_s6, [#allocation4], %s3102_s13, %s3102_s13, %s2760_s14  }
  0x2c   : > { %s2761_s17 = smov [#allocation8]  }
  0x2d   : > { %s202_s23 = sshll.u32 %s2761_s17, 4  ;;  %s203_s23 = int_to_ptr.vmem [resolvable:$true] %s202_s23 }
  0x2e   : > { %s2638_s27 = scalar_lea.vmem %s203_s23, 6144  ;;  %p2646_p3 = scmp.lt.s32.totalorder %s203_s23, %s203_s23 }
  0x2f   : > { %p2639_p1 = scmp.ne.s32.totalorder %s203_s23, %s2638_s27  ;;  %p2647_p7 = scmp.lt.s32.totalorder %s2638_s27, %s2638_s27 }
  0x31   : > { %p2641_p2 = pnand %p2639_p1, %p2577_p12  ;;  %p2648_p9 = por %p2647_p7, %p2646_p3 }
  0x33   : > { %p2642_p6 = pneg %p2641_p2 }
  0x35   : > { %p2649_p13 = pnand %p2648_p9, %p2642_p6 }
  0x37   : > { %2652 = shalt.err (!%p2649_p13)
}
  0x38   : > { %s2762_s28 = smov 64   ;;  %s2763_s30 = smov 4  }
  0x39   : > { %2246 = dma.hbm_to_vmem [thread:$0]  (!%p2847_p11), %s3097_s2, 6144, %s203_s23, [#allocation7], %s2762_s28, %s2762_s28, %s2763_s30  }
  0x3a   : > { %s2881_s8 = sadd.s32 1, %s2753_s21   ;;  %s114_s10 = sadd.s32 1, %s2749_s20 }
  0x3b   : > { %s111_s9 = ssub.s32 %s2753_s21, %s2881_s8  ;;  %p121_p0 = scmp.ne.s32.totalorder %s2749_s20, %s2745_s19 }
  0x3c   : > { %p112_p12 = scmp.eq.s32.totalorder %s111_s9, 0  ;;  %p122_p5 = scmp.eq.s32.totalorder %s2753_s21, 0 }
  0x3d   : > { %p2258_p10 = scmp.lt.s32.totalorder %s2753_s21, 2  ;;  %p3110_p2 = scmp.eq.s32.totalorder %s2819_s22, 1 }
  0x3e   : > { %s2891_s11 = scalar_select %p112_p12, %s2749_s20, %s114_s10  }
  0x3f   : > { %p123_p1 = por %p122_p5, %p121_p0  ;;  %p2895_p6 = por %p3110_p2, %p121_p0 }
  0x40   : > { %s219_s29 = sand.u32 1, %s2749_s20   ;;  %s2130_s15 = sshll.u32 %s2753_s21, 8 }
  0x41   : > { %s3111_s12 = scalar_select %p2895_p6, 1, 0 }
  0x42   : > { %s1931_s16 = sshll.u32 %s219_s29, 4  ;;  %s2904_s27 = scalar_lea.hbm %s3099_s4, %s2130_s15 }
  0x43   : > { %s223_s28 = scalar_lea.vmem [#allocation9], %s1931_s16  ;;  %p2906_p11 = pnand %p2258_p10, %p123_p1 }
  0x44   : > { %s230_s30 = sshll.u32 %s223_s28, 4  ;;  %s2912_s7 = scalar_lea.sflag [#allocation10], %s219_s29  ;;  %s2910_s30 = int_to_ptr.vmem [resolvable:$true] %s230_s30 }
  0x45   : > { %s2653_s9 = scalar_lea.hbm %s2904_s27, 256  ;;  %p2655_p7 = pneg %p2906_p11 }
  0x46   : > { %p2654_p3 = scmp.ne.s32.totalorder %s2904_s27, %s2653_s9  ;;  %s2658_s16 = scalar_lea.hbm %s3099_s4, 512 }
  0x47   : > { %p2659_p12 = scmp.lt.s32.totalorder %s2904_s27, %s3099_s4  ;;  %p2660_p0 = scmp.lt.s32.totalorder %s2658_s16, %s2653_s9 }
  0x48   : > { %p2656_p9 = pnand %p2655_p7, %p2654_p3 }
  0x49   : > { %p2661_p5 = por %p2660_p0, %p2659_p12 }
  0x4a   : > { %p2657_p13 = pneg %p2656_p9 }
  0x4c   : > { %p2662_p10 = pnand %p2661_p5, %p2657_p13 }
  0x4e   : > { %2665 = shalt.err (!%p2662_p10)
}
  0x4f   : > { %s2666_s29 = scalar_lea.vmem %s2910_s30, 256  ;;  %s2764_s28 = smov [#allocation9]  }
  0x50   : > { %p2667_p1 = scmp.ne.s32.totalorder %s2910_s30, %s2666_s29  ;;  %s2671_s13 = sshll.u32 %s2764_s28, 4  ;;  %s2672_s13 = int_to_ptr.vmem [resolvable:$false] %s2671_s13 }
  0x51   : > { %s2673_s10 = scalar_lea.vmem %s2672_s13, 512  ;;  %p2674_p9 = scmp.lt.s32.totalorder %s2910_s30, %s2672_s13 }
  0x52   : > { %p2669_p2 = pnand %p2667_p1, %p2655_p7  ;;  %p2675_p6 = scmp.lt.s32.totalorder %s2673_s10, %s2666_s29 }
  0x54   : > { %p2670_p3 = pneg %p2669_p2  ;;  %p2676_p4 = por %p2675_p6, %p2674_p9 }
  0x56   : > { %p2677_p8 = pnand %p2676_p4, %p2670_p3 }
  0x58   : > { %2680 = shalt.err (!%p2677_p8)
}
  0x59   : > { %s3113_s9 = smov 128   ;;  %p3114_p7 = scmp.ne.s32.totalorder %s3108_s26, 0 }
  0x5a   : > { %2250 = dma.hbm_to_vmem [thread:$0]  (!%p2906_p11), %s2904_s27, 256, %s2910_s30, %s2912_s7, %s3113_s9, %s3113_s9, %s2760_s14  }
  0x5b   : > { %242 = sbr.rel (%p3114_p7) target bundleno = 1613 (0x64d), region = 40  ;;  %p3115_p13 = scmp.eq.s32.totalorder (!%p3114_p7), %s2819_s22, 0 }
  0x60   : > { %2724 = dma.done.wait (%p3115_p13), [#allocation4], 12288   ;;  %p3116_p12 = pmov %p3115_p13 }
  0x62   : > { %2726 = vsyncadd (%p3116_p12), [#allocation4], 4294955008  ;;  %p3117_p4 = pmov %p3116_p12 }
  0x64   : > { %2728 = dma.done.wait (%p3117_p4), [#allocation7], 6240   ;;  %p3118_p8 = pmov %p3117_p4 }
  0x65   : > { %s2947_s13 = sand.u32 1, %s2745_s19   ;;  %p3119_p6 = scmp.ne.s32.totalorder %s3106_s24, 0 }
  0x66   : > { %2730 = vsyncadd (%p3118_p8), [#allocation7], 4294961056  ;;  %s1938_s26 = sshll.u32 %s2947_s13, 4  ;;  %s257_s14 = scalar_lea.sflag [#allocation10], %s2947_s13 }
  0x67   : > { %s260_s27 = scalar_lea.vmem [#allocation9], %s1938_s26 }
  0x68   : > { %2732 = dma.done.wait (%p3119_p6), %s257_s14, 256  }
  0x69   : > { %2734 = vsyncadd (%p3119_p6), %s257_s14, 4294967040  ;;  %v2306_v0 = vld [vmem:[#allocation3 + $0x74] ss:$8 sps:$4 sm:$0xff]   ;;  %v2308_v1 = vld [vmem:[#allocation3 + $0x70] ss:$8 sps:$4 sm:$0xff]   ;;  %v340_v54 = vlaneseq  ;;  %s2143_s17 = sshll.u32 %s2819_s22, 8 }
  0x6a   : > { %520 = vmatprep.subr.bf16.mxu0 %v2306_v0  ;;  %v2309_v2 = vld [vmem:[#allocation3 + $0x64] ss:$8 sps:$4 sm:$0xff]   ;;  %v2311_v3 = vld [vmem:[#allocation3 + $0x60] ss:$8 sps:$4 sm:$0xff]   ;;  %v2312_v4 = vld [vmem:[#allocation3 + $0x54] ss:$8 sps:$4 sm:$0xff]   ;;  %s3049_s9 = scalar_lea.hbm %s3100_s5, %s2143_s17 }
  0x6b   : > { %521 = vmatpush1.bf16.msra.mxu0 %v2308_v1  ;;  %v2314_v5 = vld [vmem:[#allocation3 + $0x50] ss:$8 sps:$4 sm:$0xff]   ;;  %v2315_v6 = vld [vmem:[#allocation3 + $0x44] ss:$8 sps:$4 sm:$0xff]   ;;  %v2317_v7 = vld [vmem:[#allocation3 + $0x40] ss:$8 sps:$4 sm:$0xff]  }
  0x6c   : > { %522 = vmatprep.subr.bf16.mxu0 %v2309_v2  ;;  %v2318_v8 = vld [vmem:[#allocation3 + $0x34] ss:$8 sps:$4 sm:$0xff]   ;;  %v2320_v9 = vld [vmem:[#allocation3 + $0x30] ss:$8 sps:$4 sm:$0xff]   ;;  %v2321_v10 = vld [vmem:[#allocation3 + $0x24] ss:$8 sps:$4 sm:$0xff]  }
  0x6d   : > { %v2323_v11 = vld [vmem:[#allocation3 + $0x20] ss:$8 sps:$4 sm:$0xff]   ;;  %v2324_v12 = vld [vmem:[#allocation3 + $0x14] ss:$8 sps:$4 sm:$0xff]   ;;  %v2326_v13 = vld [vmem:[#allocation3 + $0x10] ss:$8 sps:$4 sm:$0xff]  }
  0x6e   : > { %v2957_v14 = vld [vmem:[%s260_s27] sm:$0xff]  ;;  %v2959_v15 = vld [vmem:[%s260_s27 + $0x8] sm:$0xff]  ;;  %v2967_v55 = vshrl.u32 %v340_v54, 7  ;;  %s286_s23 = scalar_lea.vmem [#allocation11], %s1938_s26  ;;  %s1808_s22 = scalar_lea.sflag [#allocation5], %s2947_s13 }
  0x6f   : > { %523 = vmatpush1.bf16.msra.mxu0 %v2311_v3  ;;  %v2327_v16 = vld [vmem:[#allocation3 + $0x4] ss:$8 sps:$4 sm:$0xff]   ;;  %v2147_v17 = vpack.c.bf16 %v2957_v14, %v2957_v14  ;;  %v2152_v18 = vpack.c.bf16 %v2959_v15, %v2959_v15  ;;  %v2573_v19 = vpack.c.bf16 %v2959_v15, %v2957_v14  ;;  %v2329_v20 = vld [vmem:[#allocation3] ss:$8 sps:$4 sm:$0xff]   ;;  %v2330_v21 = vld [vmem:[#allocation3 + $0xf4] ss:$8 sps:$4 sm:$0xff]  }
  0x70   : > { %524 = vmatprep.subr.bf16.mxu0 %v2312_v4  ;;  %v2332_v22 = vld [vmem:[#allocation3 + $0xf0] ss:$8 sps:$4 sm:$0xff]   ;;  %v2333_v23 = vld [vmem:[#allocation3 + $0xe4] ss:$8 sps:$4 sm:$0xff]   ;;  %v2335_v24 = vld [vmem:[#allocation3 + $0xe0] ss:$8 sps:$4 sm:$0xff]  }
  0x71   : > { %2148 = vst [vmem:[#allocation2] sm:$0xff] %v2147_v17   ;;  %2154 = vst [vmem:[#allocation2 + $0x8] sm:$0xff] %v2152_v18   ;;  %552 = vmatprep.mubr.bf16.mxu0 %v2573_v19  ;;  %v2336_v25 = vld [vmem:[#allocation3 + $0xd4] ss:$8 sps:$4 sm:$0xff]   ;;  %v2338_v26 = vld [vmem:[#allocation3 + $0xd0] ss:$8 sps:$4 sm:$0xff]  }
  0x72   : > { %v2339_v27 = vld [vmem:[#allocation3 + $0xc4] ss:$8 sps:$4 sm:$0xff]   ;;  %v2341_v28 = vld [vmem:[#allocation3 + $0xc0] ss:$8 sps:$4 sm:$0xff]   ;;  %v2342_v29 = vld [vmem:[#allocation3 + $0xb4] ss:$8 sps:$4 sm:$0xff]  }
  0x73   : > { %525 = vmatpush1.bf16.msra.mxu0 %v2314_v5  ;;  %v2344_v30 = vld [vmem:[#allocation3 + $0xb0] ss:$8 sps:$4 sm:$0xff]   ;;  %v2345_v31 = vld [vmem:[#allocation3 + $0xa4] ss:$8 sps:$4 sm:$0xff]   ;;  %v2347_v32 = vld [vmem:[#allocation3 + $0xa0] ss:$8 sps:$4 sm:$0xff]  }
  0x74   : > { %526 = vmatprep.subr.bf16.mxu0 %v2315_v6  ;;  %v2348_v33 = vld [vmem:[#allocation3 + $0x94] ss:$8 sps:$4 sm:$0xff]   ;;  %v2350_v34 = vld [vmem:[#allocation3 + $0x90] ss:$8 sps:$4 sm:$0xff]   ;;  %v2351_v35 = vld [vmem:[#allocation3 + $0x84] ss:$8 sps:$4 sm:$0xff]  }
  0x75   : > { %v2353_v36 = vld [vmem:[#allocation3 + $0x80] ss:$8 sps:$4 sm:$0xff]   ;;  %v2356_v39 = vld [vmem:[#allocation8 + $0x70] sm:$0xff]   ;;  %v2358_v41 = vld [vmem:[#allocation8 + $0x68] sm:$0xff]   ;;  %v2970_v56 = vsub.s32 1, %v2967_v55  ;;  %s1821_s29 = sshll.u32 %s286_s23, 4  ;;  %s3051_s29 = int_to_ptr.vmem [resolvable:$true] %s1821_s29 }
  0x76   : > { %v2354_v37 = vld [vmem:[#allocation8 + $0x78] sm:$0xff]   ;;  %v2357_v40 = vld [vmem:[#allocation8 + $0x30] sm:$0xff]   ;;  %v2359_v42 = vld [vmem:[#allocation8 + $0x28] sm:$0xff]   ;;  %s2681_s14 = scalar_lea.vmem %s3051_s29, 256  ;;  %p3120_p0 = scmp.ne.s32.totalorder %s3111_s12, 0 }
  0x77   : > { %527 = vmatpush1.bf16.msra.mxu0 %v2317_v7  ;;  %v2355_v38 = vld [vmem:[#allocation8 + $0x38] sm:$0xff]   ;;  %2155 = vmatprep.subr.bf16.mxu1 %v2354_v37  ;;  %v2360_v43 = vld [vmem:[#allocation8 + $0x60] sm:$0xff]   ;;  %v2364_v47 = vld [vmem:[#allocation8 + $0x50] sm:$0xff]   ;;  %p2682_p11 = scmp.ne.s32.totalorder %s3051_s29, %s2681_s14  ;;  %s2765_s26 = smov [#allocation11]  }
  0x78   : > { %528 = vmatprep.subr.bf16.mxu0 %v2318_v8  ;;  %2156 = vmatpush3.bf16.msra.mxu1 %v2355_v38  ;;  %v2361_v44 = vld [vmem:[#allocation8 + $0x20] sm:$0xff]   ;;  %v2362_v45 = vld [vmem:[#allocation8 + $0x58] sm:$0xff]   ;;  %v2365_v48 = vld [vmem:[#allocation8 + $0x10] sm:$0xff]   ;;  %s2685_s27 = sshll.u32 %s2765_s26, 4  ;;  %s2686_s27 = int_to_ptr.vmem [resolvable:$false] %s2685_s27 }
  0x79   : > { %2157 = vmatprep.subr.bf16.mxu1 %v2356_v39  ;;  %v2363_v46 = vld [vmem:[#allocation8 + $0x18] sm:$0xff]   ;;  %v2366_v49 = vld [vmem:[#allocation8 + $0x48] sm:$0xff]   ;;  %v2368_v51 = vld [vmem:[#allocation8 + $0x40] sm:$0xff]   ;;  %p2683_p5 = pnand %p2682_p11, %p3120_p0  ;;  %s2687_s24 = scalar_lea.vmem %s2686_s27, 512 }
  0x7a   : > { %v2367_v50 = vld [vmem:[#allocation8 + $0x8] sm:$0xff]   ;;  %v2369_v52 = vld [vmem:[#allocation8] sm:$0xff]   ;;  %v2972_v57 = vld [vmem:[#allocation6] sm:$0x3]  ;;  %p2688_p1 = scmp.lt.s32.totalorder %s3051_s29, %s2686_s27  ;;  %p2689_p2 = scmp.lt.s32.totalorder %s2687_s24, %s2681_s14 }
  0x7b   : > { %529 = vmatpush1.bf16.msra.mxu0 %v2320_v9  ;;  %v2375_v53 = vld [vmem:[#allocation3 + $0x174] ss:$8 sps:$4 sm:$0xff]   ;;  %v347_v58 = vrot.slane %v2972_v57, %v2970_v56  ;;  %v2372_v17 = vld [vmem:[#allocation2] ss:$8 sps:$4 sm:$0xff]   ;;  %v2378_v18 = vld [vmem:[#allocation3 + $0x164] ss:$8 sps:$4 sm:$0xff]   ;;  %p2684_p10 = pneg %p2683_p5 }
  0x7c   : > { %530 = vmatprep.subr.bf16.mxu0 %v2321_v10  ;;  %2158 = vmatpush3.bf16.msra.mxu1 %v2357_v40  ;;  %v2403_v37 = vld [vmem:[#allocation3 + $0x1d0] ss:$8 sps:$4 sm:$0xff]   ;;  %v2408_v38 = vld [vmem:[#allocation3 + $0x1c4] ss:$8 sps:$4 sm:$0xff]   ;;  %v2406_v39 = vld [vmem:[#allocation3 + $0x1c0] ss:$8 sps:$4 sm:$0xff]   ;;  %p2690_p3 = por %p2689_p2, %p2688_p1 }
  0x7d   : > { %2159 = vmatprep.subr.bf16.mxu1 %v2358_v41  ;;  %v2411_v40 = vld [vmem:[#allocation3 + $0x1b4] ss:$8 sps:$4 sm:$0xff]   ;;  %v2409_v41 = vld [vmem:[#allocation3 + $0x1b0] ss:$8 sps:$4 sm:$0xff]  }
  0x7e   : > { %p2691_p9 = pnand %p2690_p3, %p2684_p10 }
  0x7f   : > { %531 = vmatpush1.bf16.msra.mxu0 %v2323_v11 }
  0x80   : > { %532 = vmatprep.subr.bf16.mxu0 %v2324_v12  ;;  %2160 = vmatpush3.bf16.msra.mxu1 %v2359_v42  ;;  %v2414_v42 = vld [vmem:[#allocation3 + $0x1a4] ss:$8 sps:$4 sm:$0xff]  }
  0x81   : > { %2161 = vmatprep.subr.bf16.mxu1 %v2360_v43  ;;  %v2412_v43 = vld [vmem:[#allocation3 + $0x1a0] ss:$8 sps:$4 sm:$0xff]  }
  0x83   : > { %533 = vmatpush1.bf16.msra.mxu0 %v2326_v13  ;;  %v2373_v13 = vld [vmem:[#allocation3 + $0x170] ss:$8 sps:$4 sm:$0xff]  }
  0x84   : > { %534 = vmatprep.subr.bf16.mxu0 %v2327_v16  ;;  %2162 = vmatpush3.bf16.msra.mxu1 %v2361_v44  ;;  %v2415_v44 = vld [vmem:[#allocation3 + $0x190] ss:$8 sps:$4 sm:$0xff]  }
  0x85   : > { %2163 = vmatprep.subr.bf16.mxu1 %v2362_v45  ;;  %v2417_v45 = vld [vmem:[#allocation3 + $0x194] ss:$8 sps:$4 sm:$0xff]  }
  0x87   : > { %535 = vmatpush1.bf16.msra.mxu0 %v2329_v20  ;;  %v2381_v20 = vld [vmem:[#allocation3 + $0x154] ss:$8 sps:$4 sm:$0xff]  }
  0x88   : > { %536 = vmatprep.subr.bf16.mxu0 %v2330_v21  ;;  %2164 = vmatpush3.bf16.msra.mxu1 %v2363_v46  ;;  %v2379_v21 = vld [vmem:[#allocation3 + $0x150] ss:$8 sps:$4 sm:$0xff]   ;;  %v2420_v46 = vld [vmem:[#allocation3 + $0x184] ss:$8 sps:$4 sm:$0xff]  }
  0x89   : > { %2165 = vmatprep.subr.bf16.mxu1 %v2364_v47  ;;  %v2418_v47 = vld [vmem:[#allocation3 + $0x180] ss:$8 sps:$4 sm:$0xff]  }
  0x8b   : > { %537 = vmatpush2.bf16.msra.mxu0 %v2332_v22  ;;  %v2384_v22 = vld [vmem:[#allocation3 + $0x144] ss:$8 sps:$4 sm:$0xff]  }
  0x8c   : > { %538 = vmatprep.subr.bf16.mxu0 %v2333_v23  ;;  %2166 = vmatpush3.bf16.msra.mxu1 %v2365_v48  ;;  %v2382_v23 = vld [vmem:[#allocation3 + $0x140] ss:$8 sps:$4 sm:$0xff]   ;;  %v2983_v48 = vsub.s32 0, %v2967_v55 }
  0x8d   : > { %2167 = vmatprep.subr.bf16.mxu1 %v2366_v49 }
  0x8e   : > { %v343_v49 = vrot.slane %v2972_v57, %v2983_v48 }
  0x8f   : > { %539 = vmatpush2.bf16.msra.mxu0 %v2335_v24  ;;  %v2387_v24 = vld [vmem:[#allocation3 + $0x134] ss:$8 sps:$4 sm:$0xff]  }
  0x90   : > { %540 = vmatprep.subr.bf16.mxu0 %v2336_v25  ;;  %2168 = vmatpush3.bf16.msra.mxu1 %v2367_v50  ;;  %v2385_v25 = vld [vmem:[#allocation3 + $0x130] ss:$8 sps:$4 sm:$0xff]  }
  0x91   : > { %2169 = vmatprep.subr.bf16.mxu1 %v2368_v51 }
  0x93   : > { %541 = vmatpush2.bf16.msra.mxu0 %v2338_v26  ;;  %v2390_v26 = vld [vmem:[#allocation3 + $0x124] ss:$8 sps:$4 sm:$0xff]  }
  0x94   : > { %542 = vmatprep.subr.bf16.mxu0 %v2339_v27  ;;  %2170 = vmatpush3.bf16.msra.mxu1 %v2369_v52  ;;  %v2388_v27 = vld [vmem:[#allocation3 + $0x120] ss:$8 sps:$4 sm:$0xff]  }
  0x95   : > { %1023 = vmatprep.subr.bf16.mxu1 %v2375_v53 }
  0x97   : > { %543 = vmatpush2.bf16.msra.mxu0 %v2341_v28  ;;  %v2393_v28 = vld [vmem:[#allocation3 + $0x114] ss:$8 sps:$4 sm:$0xff]  }
  0x98   : > { %544 = vmatprep.subr.bf16.mxu0 %v2342_v29  ;;  %v2391_v29 = vld [vmem:[#allocation3 + $0x110] ss:$8 sps:$4 sm:$0xff]  }
  0x9b   : > { %545 = vmatpush2.bf16.msra.mxu0 %v2344_v30  ;;  %v2396_v30 = vld [vmem:[#allocation3 + $0x104] ss:$8 sps:$4 sm:$0xff]  }
  0x9c   : > { %546 = vmatprep.subr.bf16.mxu0 %v2345_v31  ;;  %v2394_v31 = vld [vmem:[#allocation3 + $0x100] ss:$8 sps:$4 sm:$0xff]  }
  0x9f   : > { %547 = vmatpush2.bf16.msra.mxu0 %v2347_v32  ;;  %v2399_v32 = vld [vmem:[#allocation3 + $0x1f4] ss:$8 sps:$4 sm:$0xff]  }
  0xa0   : > { %548 = vmatprep.subr.bf16.mxu0 %v2348_v33  ;;  %v2397_v33 = vld [vmem:[#allocation3 + $0x1f0] ss:$8 sps:$4 sm:$0xff]  }
  0xa3   : > { %549 = vmatpush2.bf16.msra.mxu0 %v2350_v34  ;;  %v2402_v34 = vld [vmem:[#allocation3 + $0x1e4] ss:$8 sps:$4 sm:$0xff]  }
  0xa4   : > { %550 = vmatprep.subr.bf16.mxu0 %v2351_v35  ;;  %v2400_v35 = vld [vmem:[#allocation3 + $0x1e0] ss:$8 sps:$4 sm:$0xff]  }
  0xa7   : > { %551 = vmatpush2.bf16.msra.mxu0 %v2353_v36  ;;  %v2405_v36 = vld [vmem:[#allocation3 + $0x1d4] ss:$8 sps:$4 sm:$0xff]  }
  0xaa   : > { %553 = vmatmul.mubr.bf16.vlgmr.msra.gmra.mxu0 %v2573_v19  ;;  %v2376_v19 = vld [vmem:[#allocation3 + $0x160] ss:$8 sps:$4 sm:$0xff]  }
 0x16a   : > { %v2976_v59 = vpop.f32.mrf.mxu0 }
 0x16b   : > { %v555_v50 = vadd.f32 %v2976_v59, %v343_v49 }
 0x16c   : > { %v556_v60 = vpop.f32.mrf.mxu0 }
 0x16d   : > { %v557_v61 = vadd.f32 %v556_v60, %v347_v58  ;;  %v1976_v51 = vmul.f32 -1.442695, %v555_v50  ;;  %v1982_v60 = vld [vmem:[%s3098_s3] ss:$0 sm:$0xff] }
 0x16e   : > { %v2978_v62 = vpop.f32.mrf.mxu0 }
 0x16f   : > { %v1978_v63 = vmul.f32 -1.442695, %v557_v61  ;;  %v559_v52 = vadd.f32 %v2978_v62, %v343_v49 }
 0x170   : > { %v560_v0 = vpop.f32.mrf.mxu0 }
 0x171   : > { %2513 = vpow2.f32 %v1978_v63  ;;  %v561_v1 = vadd.f32 %v560_v0, %v347_v58  ;;  %v1977_v53 = vmul.f32 -1.442695, %v559_v52 }
 0x173   : > { %v1979_v2 = vmul.f32 -1.442695, %v561_v1 }
 0x175   : > { %2515 = vpow2.f32 %v1979_v2 }
 0x17e   : > { %v2514_v3 = vpop.eup %2513 }
 0x17f   : > { %v581_v4 = vadd.f32 1.0, %v2514_v3 }
 0x181   : > { %2517 = vrcp.f32 %v581_v4 }
 0x182   : > { %v2516_v5 = vpop.eup %2515 }
 0x183   : > { %v582_v6 = vadd.f32 1.0, %v2516_v5 }
 0x185   : > { %2519 = vrcp.f32 %v582_v6 }
 0x186   : > { %2521 = vpow2.f32 %v1976_v51 }
 0x187   : > { %2523 = vpow2.f32 %v1977_v53 }
 0x18e   : > { %v2518_v7 = vpop.eup %2517 }
 0x18f   : > { %v587_v8 = vmul.f32 %v2518_v7, %v2957_v14 }
 0x191   : > { %v2133_v9 = vpack.c.bf16 %v587_v8, %v587_v8 }
 0x192   : > { %v2520_v10 = vpop.eup %2519 }
 0x193   : > { %597 = vst [vmem:[#allocation2 + $0x4] sm:$0xf] %v2133_v9  ;;  %v588_v11 = vmul.f32 %v2520_v10, %v2959_v15  ;;  %v2522_v58 = vpop.eup %2521 }
 0x194   : > { %v569_v0 = vadd.f32 1.0, %v2522_v58  ;;  %v2524_v57 = vpop.eup %2523 }
 0x195   : > { %v2134_v12 = vpack.c.bf16 %v588_v11, %v588_v11  ;;  %v570_v62 = vadd.f32 1.0, %v2524_v57  ;;  %v2449_v57 = vld [vmem:[#allocation3 + $0x250] ss:$8 sps:$4 sm:$0xff]  }
 0x197   : > { %598 = vst [vmem:[#allocation2 + $0xc] sm:$0xf] %v2134_v12 }
 0x19e   : > { %v2370_v16 = vld [vmem:[#allocation2 + $0x4] ss:$8 sps:$4 sm:$0xff]  }
 0x19f   : > { %778 = vmatprep.mubr.bf16.mxu1 %v2370_v16 }
 0x1a0   : > { %779 = vmatmul.mubr.bf16.vlgmr.msra.gmra.mxu1 %v2372_v17 }
 0x1a1   : > { %1024 = vmatpush1.bf16.msra.mxu1 %v2373_v13 }
 0x1a2   : > { %1025 = vmatprep.subr.bf16.mxu1 %v2378_v18 }
 0x1a5   : > { %1026 = vmatpush1.bf16.msra.mxu1 %v2376_v19  ;;  %v2423_v19 = vld [vmem:[#allocation2] ss:$8 sps:$4 sm:$0xff]  }
 0x1a6   : > { %1027 = vmatprep.subr.bf16.mxu1 %v2381_v20  ;;  %v2425_v20 = vld [vmem:[#allocation8 + $0xb8] sm:$0xff]  }
 0x1a9   : > { %1028 = vmatpush1.bf16.msra.mxu1 %v2379_v21  ;;  %v2426_v21 = vld [vmem:[#allocation8 + $0xf0] sm:$0xff]  }
 0x1aa   : > { %1029 = vmatprep.subr.bf16.mxu1 %v2384_v22  ;;  %v2427_v22 = vld [vmem:[#allocation8 + $0xb0] sm:$0xff]  }
 0x1ad   : > { %1030 = vmatpush1.bf16.msra.mxu1 %v2382_v23  ;;  %v2428_v23 = vld [vmem:[#allocation8 + $0xe8] sm:$0xff]  }
 0x1ae   : > { %1031 = vmatprep.subr.bf16.mxu1 %v2387_v24  ;;  %v2429_v24 = vld [vmem:[#allocation8 + $0xa8] sm:$0xff]  }
 0x1b1   : > { %1032 = vmatpush1.bf16.msra.mxu1 %v2385_v25  ;;  %v2431_v25 = vld [vmem:[#allocation8 + $0xa0] sm:$0xff]  }
 0x1b2   : > { %1033 = vmatprep.subr.bf16.mxu1 %v2390_v26  ;;  %v2432_v26 = vld [vmem:[#allocation8 + $0xd8] sm:$0xff]  }
 0x1b5   : > { %1034 = vmatpush1.bf16.msra.mxu1 %v2388_v27  ;;  %v2433_v27 = vld [vmem:[#allocation8 + $0x98] sm:$0xff]  }
 0x1b6   : > { %1035 = vmatprep.subr.bf16.mxu1 %v2393_v28  ;;  %v2434_v28 = vld [vmem:[#allocation8 + $0xd0] sm:$0xff]  }
 0x1b9   : > { %1036 = vmatpush1.bf16.msra.mxu1 %v2391_v29  ;;  %v2435_v29 = vld [vmem:[#allocation8 + $0x90] sm:$0xff]  }
 0x1ba   : > { %1037 = vmatprep.subr.bf16.mxu1 %v2396_v30  ;;  %v2436_v30 = vld [vmem:[#allocation8 + $0xc8] sm:$0xff]  }
 0x1bd   : > { %1038 = vmatpush1.bf16.msra.mxu1 %v2394_v31  ;;  %v2437_v31 = vld [vmem:[#allocation8 + $0x88] sm:$0xff]  }
 0x1be   : > { %1039 = vmatprep.subr.bf16.mxu1 %v2399_v32  ;;  %v2438_v32 = vld [vmem:[#allocation8 + $0xc0] sm:$0xff]  }
 0x1c1   : > { %1040 = vmatpush2.bf16.msra.mxu1 %v2397_v33  ;;  %v2439_v33 = vld [vmem:[#allocation8 + $0x80] sm:$0xff]  }
 0x1c2   : > { %1041 = vmatprep.subr.bf16.mxu1 %v2402_v34  ;;  %v2445_v34 = vld [vmem:[#allocation3 + $0x274] ss:$8 sps:$4 sm:$0xff]  }
 0x1c5   : > { %1042 = vmatpush2.bf16.msra.mxu1 %v2400_v35  ;;  %v3004_v35 = vld [vmem:[#allocation6 + $0x2] sm:$0x3] }
 0x1c6   : > { %1043 = vmatprep.subr.bf16.mxu1 %v2405_v36  ;;  %v850_v36 = vrot.slane %v3004_v35, %v2970_v56 }
 0x1c9   : > { %1044 = vmatpush2.bf16.msra.mxu1 %v2403_v37 }
 0x1ca   : > { %1045 = vmatprep.subr.bf16.mxu1 %v2408_v38 }
 0x1cd   : > { %1046 = vmatpush2.bf16.msra.mxu1 %v2406_v39 }
 0x1ce   : > { %1047 = vmatprep.subr.bf16.mxu1 %v2411_v40 }
 0x1d1   : > { %1048 = vmatpush2.bf16.msra.mxu1 %v2409_v41 }
 0x1d2   : > { %1049 = vmatprep.subr.bf16.mxu1 %v2414_v42 }
 0x1d5   : > { %1050 = vmatpush2.bf16.msra.mxu1 %v2412_v43 }
 0x1d6   : > { %1051 = vmatprep.subr.bf16.mxu1 %v2417_v45 }
 0x1d9   : > { %1052 = vmatpush2.bf16.msra.mxu1 %v2415_v44 }
 0x1da   : > { %1053 = vmatprep.subr.bf16.mxu1 %v2420_v46 }
 0x1dd   : > { %1054 = vmatpush2.bf16.msra.mxu1 %v2418_v47 }
 0x260   : > { %v2171_v54 = vpop.f32.mrf.mxu1 }
 0x262   : > { %v2172_v61 = vpop.f32.mrf.mxu1 }
 0x263   : > { %v2173_v55 = vadd.f32 %v2172_v61, %v2171_v54 }
 0x264   : > { %v2174_v63 = vpop.f32.mrf.mxu1 }
 0x265   : > { %v781_v1 = vadd.f32 %v2173_v55, %v1982_v60  ;;  %v2442_v55 = vld [vmem:[#allocation2] ss:$8 sps:$4 sm:$0xff]  }
 0x266   : > { %v2175_v2 = vpop.f32.mrf.mxu1 }
 0x267   : > { %2525 = vtanh.f32 %v781_v1  ;;  %v2176_v59 = vadd.f32 %v2175_v2, %v2174_v63  ;;  %v2448_v63 = vld [vmem:[#allocation3 + $0x264] ss:$8 sps:$4 sm:$0xff]   ;;  %v2451_v1 = vld [vmem:[#allocation3 + $0x254] ss:$8 sps:$4 sm:$0xff]  }
 0x268   : > { %2527 = vrcp.f32 %v569_v0  ;;  %v2446_v0 = vld [vmem:[#allocation3 + $0x260] ss:$8 sps:$4 sm:$0xff]   ;;  %v2454_v2 = vld [vmem:[#allocation3 + $0x244] ss:$8 sps:$4 sm:$0xff]  }
 0x269   : > { %v784_v3 = vadd.f32 %v2176_v59, %v1982_v60  ;;  %v2443_v60 = vld [vmem:[#allocation3 + $0x270] ss:$8 sps:$4 sm:$0xff]   ;;  %v2452_v59 = vld [vmem:[#allocation3 + $0x240] ss:$8 sps:$4 sm:$0xff]  }
 0x26b   : > { %2529 = vtanh.f32 %v784_v3  ;;  %v2455_v3 = vld [vmem:[#allocation3 + $0x230] ss:$8 sps:$4 sm:$0xff]  }
 0x26c   : > { %2531 = vrcp.f32 %v570_v62  ;;  %v2457_v62 = vld [vmem:[#allocation3 + $0x234] ss:$8 sps:$4 sm:$0xff]  }
 0x274   : > { %v2526_v4 = vpop.eup %2525 }
 0x275   : > { %v789_v5 = vsub.f32 %v2526_v4, %v2957_v14  ;;  %v2528_v6 = vpop.eup %2527  ;;  %v2460_v4 = vld [vmem:[#allocation3 + $0x224] ss:$8 sps:$4 sm:$0xff]  }
 0x277   : > { %v791_v7 = vmul.f32 %v2528_v6, %v789_v5  ;;  %v2458_v5 = vld [vmem:[#allocation3 + $0x220] ss:$8 sps:$4 sm:$0xff]   ;;  %v2463_v6 = vld [vmem:[#allocation3 + $0x214] ss:$8 sps:$4 sm:$0xff]  }
 0x278   : > { %v2530_v8 = vpop.eup %2529 }
 0x279   : > { %v2994_v9 = vadd.f32 %v791_v7, %v2957_v14  ;;  %v790_v10 = vsub.f32 %v2530_v8, %v2959_v15  ;;  %v2532_v11 = vpop.eup %2531  ;;  %v2424_v14 = vld [vmem:[#allocation8 + $0xf8] sm:$0xff]   ;;  %v2461_v7 = vld [vmem:[#allocation3 + $0x210] ss:$8 sps:$4 sm:$0xff]  }
 0x27a   : > { %2177 = vmatprep.subr.bf16.mxu0 %v2424_v14  ;;  %v2466_v8 = vld [vmem:[#allocation3 + $0x204] ss:$8 sps:$4 sm:$0xff]  }
 0x27b   : > { %v2135_v12 = vpack.c.bf16 %v2994_v9, %v2994_v9  ;;  %v792_v13 = vmul.f32 %v2532_v11, %v790_v10  ;;  %2178 = vmatpush3.bf16.msra.mxu0 %v2425_v20  ;;  %v2464_v10 = vld [vmem:[#allocation3 + $0x200] ss:$8 sps:$4 sm:$0xff]   ;;  %v2469_v11 = vld [vmem:[#allocation3 + $0x2f4] ss:$8 sps:$4 sm:$0xff]   ;;  %v2478_v14 = vld [vmem:[#allocation3 + $0x2c4] ss:$8 sps:$4 sm:$0xff]  }
 0x27c   : > { %2179 = vmatprep.subr.bf16.mxu0 %v2426_v21  ;;  %v2476_v20 = vld [vmem:[#allocation3 + $0x2c0] ss:$8 sps:$4 sm:$0xff]   ;;  %v2481_v21 = vld [vmem:[#allocation3 + $0x2b4] ss:$8 sps:$4 sm:$0xff]  }
 0x27d   : > { %803 = vst [vmem:[#allocation2 + $0x4] sm:$0xf] %v2135_v12  ;;  %v3000_v16 = vadd.f32 %v792_v13, %v2959_v15  ;;  %v2430_v15 = vld [vmem:[#allocation8 + $0xe0] sm:$0xff]   ;;  %v2467_v12 = vld [vmem:[#allocation3 + $0x2f0] ss:$8 sps:$4 sm:$0xff]  }
 0x27e   : > { %v2472_v13 = vld [vmem:[#allocation3 + $0x2e4] ss:$8 sps:$4 sm:$0xff]  }
 0x27f   : > { %v2136_v17 = vpack.c.bf16 %v3000_v16, %v3000_v16  ;;  %2180 = vmatpush3.bf16.msra.mxu0 %v2427_v22  ;;  %v2479_v22 = vld [vmem:[#allocation3 + $0x2b0] ss:$8 sps:$4 sm:$0xff]  }
 0x280   : > { %2181 = vmatprep.subr.bf16.mxu0 %v2428_v23  ;;  %v2484_v23 = vld [vmem:[#allocation3 + $0x2a4] ss:$8 sps:$4 sm:$0xff]  }
 0x281   : > { %804 = vst [vmem:[#allocation2 + $0xc] sm:$0xf] %v2136_v17  ;;  %v2470_v17 = vld [vmem:[#allocation3 + $0x2e0] ss:$8 sps:$4 sm:$0xff]  }
 0x283   : > { %2182 = vmatpush3.bf16.msra.mxu0 %v2429_v24  ;;  %v2482_v24 = vld [vmem:[#allocation3 + $0x2a0] ss:$8 sps:$4 sm:$0xff]  }
 0x284   : > { %2183 = vmatprep.subr.bf16.mxu0 %v2430_v15  ;;  %v2485_v15 = vld [vmem:[#allocation3 + $0x290] ss:$8 sps:$4 sm:$0xff]  }
 0x287   : > { %2184 = vmatpush3.bf16.msra.mxu0 %v2431_v25  ;;  %v2487_v25 = vld [vmem:[#allocation3 + $0x294] ss:$8 sps:$4 sm:$0xff]  }
 0x288   : > { %v2421_v18 = vld [vmem:[#allocation2 + $0x4] ss:$8 sps:$4 sm:$0xff]   ;;  %2185 = vmatprep.subr.bf16.mxu0 %v2432_v26  ;;  %v2490_v26 = vld [vmem:[#allocation3 + $0x284] ss:$8 sps:$4 sm:$0xff]  }
 0x289   : > { %1055 = vmatprep.mubr.bf16.mxu1 %v2421_v18  ;;  %v2475_v18 = vld [vmem:[#allocation3 + $0x2d4] ss:$8 sps:$4 sm:$0xff]  }
 0x28a   : > { %1056 = vmatmul.mubr.bf16.vlgmr.msra.gmra.mxu1 %v2423_v19  ;;  %v2473_v19 = vld [vmem:[#allocation3 + $0x2d0] ss:$8 sps:$4 sm:$0xff]  }
 0x28b   : > { %2186 = vmatpush3.bf16.msra.mxu0 %v2433_v27  ;;  %v2488_v27 = vld [vmem:[#allocation3 + $0x280] ss:$8 sps:$4 sm:$0xff]  }
 0x28c   : > { %2187 = vmatprep.subr.bf16.mxu0 %v2434_v28  ;;  %v846_v28 = vrot.slane %v3004_v35, %v2983_v48 }
 0x28f   : > { %2188 = vmatpush3.bf16.msra.mxu0 %v2435_v29 }
 0x290   : > { %2189 = vmatprep.subr.bf16.mxu0 %v2436_v30 }
 0x293   : > { %2190 = vmatpush3.bf16.msra.mxu0 %v2437_v31 }
 0x294   : > { %2191 = vmatprep.subr.bf16.mxu0 %v2438_v32 }
 0x297   : > { %2192 = vmatpush3.bf16.msra.mxu0 %v2439_v33 }
 0x298   : > { %1528 = vmatprep.subr.bf16.mxu0 %v2445_v34 }
 0x34a   : > { %v3008_v37 = vpop.f32.mrf.mxu1 }
 0x34b   : > { %v1058_v29 = vadd.f32 %v3008_v37, %v846_v28 }
 0x34c   : > { %v1059_v38 = vpop.f32.mrf.mxu1 }
 0x34d   : > { %v1060_v39 = vadd.f32 %v1059_v38, %v850_v36  ;;  %v2037_v30 = vmul.f32 -1.442695, %v1058_v29 }
 0x34e   : > { %v3010_v40 = vpop.f32.mrf.mxu1 }
 0x34f   : > { %v2039_v41 = vmul.f32 -1.442695, %v1060_v39  ;;  %v1062_v31 = vadd.f32 %v3010_v40, %v846_v28 }
 0x350   : > { %v1063_v42 = vpop.f32.mrf.mxu1 }
 0x351   : > { %2533 = vpow2.f32 %v2039_v41  ;;  %v1064_v43 = vadd.f32 %v1063_v42, %v850_v36  ;;  %v2038_v32 = vmul.f32 -1.442695, %v1062_v31  ;;  %v2044_v36 = vld [vmem:[%s3098_s3 + $0x1] ss:$0 sm:$0xff] }
 0x353   : > { %v2040_v44 = vmul.f32 -1.442695, %v1064_v43 }
 0x355   : > { %2535 = vpow2.f32 %v2040_v44 }
 0x35e   : > { %v2534_v45 = vpop.eup %2533 }
 0x35f   : > { %v1084_v46 = vadd.f32 1.0, %v2534_v45 }
 0x361   : > { %2537 = vrcp.f32 %v1084_v46 }
 0x362   : > { %v2536_v47 = vpop.eup %2535 }
 0x363   : > { %v1085_v49 = vadd.f32 1.0, %v2536_v47 }
 0x365   : > { %2539 = vrcp.f32 %v1085_v49 }
 0x366   : > { %2541 = vpow2.f32 %v2037_v30 }
 0x367   : > { %2543 = vpow2.f32 %v2038_v32 }
 0x36e   : > { %v2538_v50 = vpop.eup %2537 }
 0x36f   : > { %v1090_v51 = vmul.f32 %v2538_v50, %v2994_v9 }
 0x371   : > { %v2137_v52 = vpack.c.bf16 %v1090_v51, %v1090_v51 }
 0x372   : > { %v2540_v53 = vpop.eup %2539 }
 0x373   : > { %1100 = vst [vmem:[#allocation2 + $0x4] sm:$0xf] %v2137_v52  ;;  %v1091_v54 = vmul.f32 %v2540_v53, %v3000_v16  ;;  %v2542_v34 = vpop.eup %2541 }
 0x374   : > { %v1072_v42 = vadd.f32 1.0, %v2542_v34  ;;  %v2544_v35 = vpop.eup %2543 }
 0x375   : > { %v2138_v58 = vpack.c.bf16 %v1091_v54, %v1091_v54  ;;  %v1073_v40 = vadd.f32 1.0, %v2544_v35 }
 0x377   : > { %1101 = vst [vmem:[#allocation2 + $0xc] sm:$0xf] %v2138_v58 }
 0x37e   : > { %v2440_v61 = vld [vmem:[#allocation2 + $0x4] ss:$8 sps:$4 sm:$0xff]  }
 0x37f   : > { %1283 = vmatprep.mubr.bf16.mxu0 %v2440_v61 }
 0x380   : > { %1284 = vmatmul.mubr.bf16.vlgmr.msra.gmra.mxu0 %v2442_v55 }
 0x381   : > { %1529 = vmatpush1.bf16.msra.mxu0 %v2443_v60 }
 0x382   : > { %1530 = vmatprep.subr.bf16.mxu0 %v2448_v63 }
 0x385   : > { %1531 = vmatpush1.bf16.msra.mxu0 %v2446_v0  ;;  %v2493_v0 = vld [vmem:[#allocation2] ss:$8 sps:$4 sm:$0xff]  }
 0x386   : > { %1532 = vmatprep.subr.bf16.mxu0 %v2451_v1  ;;  %v2495_v1 = vld [vmem:[#allocation8 + $0x138] sm:$0xff]  }
 0x389   : > { %1533 = vmatpush1.bf16.msra.mxu0 %v2449_v57  ;;  %v2496_v57 = vld [vmem:[#allocation8 + $0x170] sm:$0xff]  }
 0x38a   : > { %1534 = vmatprep.subr.bf16.mxu0 %v2454_v2  ;;  %v2497_v2 = vld [vmem:[#allocation8 + $0x130] sm:$0xff]  }
 0x38d   : > { %1535 = vmatpush1.bf16.msra.mxu0 %v2452_v59  ;;  %v2498_v59 = vld [vmem:[#allocation8 + $0x168] sm:$0xff]  }
 0x38e   : > { %1536 = vmatprep.subr.bf16.mxu0 %v2457_v62  ;;  %v2499_v62 = vld [vmem:[#allocation8 + $0x128] sm:$0xff]  }
 0x391   : > { %1537 = vmatpush1.bf16.msra.mxu0 %v2455_v3  ;;  %v2501_v3 = vld [vmem:[#allocation8 + $0x120] sm:$0xff]  }
 0x392   : > { %1538 = vmatprep.subr.bf16.mxu0 %v2460_v4  ;;  %v2502_v4 = vld [vmem:[#allocation8 + $0x158] sm:$0xff]  }
 0x395   : > { %1539 = vmatpush1.bf16.msra.mxu0 %v2458_v5  ;;  %v2503_v5 = vld [vmem:[#allocation8 + $0x118] sm:$0xff]  }
 0x396   : > { %1540 = vmatprep.subr.bf16.mxu0 %v2463_v6  ;;  %v2504_v6 = vld [vmem:[#allocation8 + $0x150] sm:$0xff]  }
 0x399   : > { %1541 = vmatpush1.bf16.msra.mxu0 %v2461_v7  ;;  %v2505_v7 = vld [vmem:[#allocation8 + $0x110] sm:$0xff]  }
 0x39a   : > { %1542 = vmatprep.subr.bf16.mxu0 %v2466_v8  ;;  %v2506_v8 = vld [vmem:[#allocation8 + $0x148] sm:$0xff]  }
 0x39d   : > { %1543 = vmatpush1.bf16.msra.mxu0 %v2464_v10  ;;  %v2507_v10 = vld [vmem:[#allocation8 + $0x108] sm:$0xff]  }
 0x39e   : > { %1544 = vmatprep.subr.bf16.mxu0 %v2469_v11  ;;  %v2508_v11 = vld [vmem:[#allocation8 + $0x140] sm:$0xff]  }
 0x3a1   : > { %1545 = vmatpush2.bf16.msra.mxu0 %v2467_v12  ;;  %v2509_v12 = vld [vmem:[#allocation8 + $0x100] sm:$0xff]  }
 0x3a2   : > { %1546 = vmatprep.subr.bf16.mxu0 %v2472_v13  ;;  %v1346_v13 = vld [vmem:[#allocation6 + $0x4] sm:$0x3] }
 0x3a5   : > { %1547 = vmatpush2.bf16.msra.mxu0 %v2470_v17  ;;  %v1355_v17 = vrot.slane %v1346_v13, %v2970_v56 }
 0x3a6   : > { %1548 = vmatprep.subr.bf16.mxu0 %v2475_v18 }
 0x3a9   : > { %1549 = vmatpush2.bf16.msra.mxu0 %v2473_v19 }
 0x3aa   : > { %1550 = vmatprep.subr.bf16.mxu0 %v2478_v14 }
 0x3ad   : > { %1551 = vmatpush2.bf16.msra.mxu0 %v2476_v20 }
 0x3ae   : > { %1552 = vmatprep.subr.bf16.mxu0 %v2481_v21 }
 0x3b1   : > { %1553 = vmatpush2.bf16.msra.mxu0 %v2479_v22 }
 0x3b2   : > { %1554 = vmatprep.subr.bf16.mxu0 %v2484_v23 }
 0x3b5   : > { %1555 = vmatpush2.bf16.msra.mxu0 %v2482_v24 }
 0x3b6   : > { %1556 = vmatprep.subr.bf16.mxu0 %v2487_v25 }
 0x3b9   : > { %1557 = vmatpush2.bf16.msra.mxu0 %v2485_v15 }
 0x3ba   : > { %1558 = vmatprep.subr.bf16.mxu0 %v2490_v26 }
 0x3bd   : > { %1559 = vmatpush2.bf16.msra.mxu0 %v2488_v27 }
 0x440   : > { %v2193_v33 = vpop.f32.mrf.mxu0 }
 0x442   : > { %v2194_v38 = vpop.f32.mrf.mxu0 }
 0x443   : > { %v2195_v39 = vadd.f32 %v2194_v38, %v2193_v33  ;;  %v2510_v33 = vld [vmem:[#allocation2] ss:$8 sps:$4 sm:$0xff]  }
 0x444   : > { %v2196_v41 = vpop.f32.mrf.mxu0 }
 0x445   : > { %v1286_v43 = vadd.f32 %v2195_v39, %v2044_v36 }
 0x446   : > { %v2197_v44 = vpop.f32.mrf.mxu0 }
 0x447   : > { %2545 = vtanh.f32 %v1286_v43  ;;  %v2198_v37 = vadd.f32 %v2197_v44, %v2196_v41  ;;  %v2106_v44 = vld [vmem:[%s3098_s3 + $0x2] ss:$0 sm:$0xff] }
 0x448   : > { %2547 = vrcp.f32 %v1072_v42 }
 0x449   : > { %v1289_v45 = vadd.f32 %v2198_v37, %v2044_v36  ;;  %v1351_v36 = vrot.slane %v1346_v13, %v2983_v48 }
 0x44b   : > { %2549 = vtanh.f32 %v1289_v45 }
 0x44c   : > { %2551 = vrcp.f32 %v1073_v40 }
 0x454   : > { %v2546_v46 = vpop.eup %2545 }
 0x455   : > { %v1294_v47 = vsub.f32 %v2546_v46, %v2994_v9  ;;  %v2548_v49 = vpop.eup %2547 }
 0x457   : > { %v1296_v50 = vmul.f32 %v2548_v49, %v1294_v47 }
 0x458   : > { %v2550_v51 = vpop.eup %2549 }
 0x459   : > { %v3023_v52 = vadd.f32 %v1296_v50, %v2994_v9  ;;  %v1295_v53 = vsub.f32 %v2550_v51, %v3000_v16  ;;  %v2552_v54 = vpop.eup %2551  ;;  %v2494_v9 = vld [vmem:[#allocation8 + $0x178] sm:$0xff]  }
 0x45a   : > { %2199 = vmatprep.subr.bf16.mxu1 %v2494_v9 }
 0x45b   : > { %v2139_v58 = vpack.c.bf16 %v3023_v52, %v3023_v52  ;;  %v1297_v60 = vmul.f32 %v2552_v54, %v1295_v53  ;;  %2200 = vmatpush3.bf16.msra.mxu1 %v2495_v1 }
 0x45c   : > { %2201 = vmatprep.subr.bf16.mxu1 %v2496_v57 }
 0x45d   : > { %1308 = vst [vmem:[#allocation2 + $0x4] sm:$0xf] %v2139_v58  ;;  %v3029_v61 = vadd.f32 %v1297_v60, %v3000_v16  ;;  %v2500_v16 = vld [vmem:[#allocation8 + $0x160] sm:$0xff]  }
 0x45f   : > { %v2140_v55 = vpack.c.bf16 %v3029_v61, %v3029_v61  ;;  %2202 = vmatpush3.bf16.msra.mxu1 %v2497_v2 }
 0x460   : > { %2203 = vmatprep.subr.bf16.mxu1 %v2498_v59 }
 0x461   : > { %1309 = vst [vmem:[#allocation2 + $0xc] sm:$0xf] %v2140_v55 }
 0x463   : > { %2204 = vmatpush3.bf16.msra.mxu1 %v2499_v62 }
 0x464   : > { %2205 = vmatprep.subr.bf16.mxu1 %v2500_v16 }
 0x467   : > { %2206 = vmatpush3.bf16.msra.mxu1 %v2501_v3 }
 0x468   : > { %v2491_v63 = vld [vmem:[#allocation2 + $0x4] ss:$8 sps:$4 sm:$0xff]   ;;  %2207 = vmatprep.subr.bf16.mxu1 %v2502_v4 }
 0x469   : > { %1560 = vmatprep.mubr.bf16.mxu0 %v2491_v63 }
 0x46a   : > { %1561 = vmatmul.mubr.bf16.vlgmr.msra.gmra.mxu0 %v2493_v0 }
 0x46b   : > { %2208 = vmatpush3.bf16.msra.mxu1 %v2503_v5 }
 0x46c   : > { %2209 = vmatprep.subr.bf16.mxu1 %v2504_v6 }
 0x46f   : > { %2210 = vmatpush3.bf16.msra.mxu1 %v2505_v7 }
 0x470   : > { %2211 = vmatprep.subr.bf16.mxu1 %v2506_v8 }
 0x473   : > { %2212 = vmatpush3.bf16.msra.mxu1 %v2507_v10 }
 0x474   : > { %2213 = vmatprep.subr.bf16.mxu1 %v2508_v11 }
 0x477   : > { %2214 = vmatpush3.bf16.msra.mxu1 %v2509_v12 }
 0x52a   : > { %v1562_v18 = vpop.f32.mrf.mxu0 }
 0x52b   : > { %v1563_v38 = vadd.f32 %v1562_v18, %v1351_v36 }
 0x52c   : > { %v1564_v19 = vpop.f32.mrf.mxu0 }
 0x52d   : > { %v1565_v14 = vadd.f32 %v1564_v19, %v1355_v17  ;;  %v2099_v39 = vmul.f32 -1.442695, %v1563_v38 }
 0x52e   : > { %v1566_v20 = vpop.f32.mrf.mxu0 }
 0x52f   : > { %v2101_v21 = vmul.f32 -1.442695, %v1565_v14  ;;  %v1567_v41 = vadd.f32 %v1566_v20, %v1351_v36 }
 0x530   : > { %v1568_v22 = vpop.f32.mrf.mxu0 }
 0x531   : > { %2553 = vpow2.f32 %v2101_v21  ;;  %v1569_v23 = vadd.f32 %v1568_v22, %v1355_v17  ;;  %v2100_v42 = vmul.f32 -1.442695, %v1567_v41 }
 0x533   : > { %v2102_v24 = vmul.f32 -1.442695, %v1569_v23 }
 0x535   : > { %2555 = vpow2.f32 %v2102_v24 }
 0x53e   : > { %v2554_v15 = vpop.eup %2553 }
 0x53f   : > { %v1589_v25 = vadd.f32 1.0, %v2554_v15 }
 0x541   : > { %2557 = vrcp.f32 %v1589_v25 }
 0x542   : > { %v2556_v26 = vpop.eup %2555 }
 0x543   : > { %v1590_v27 = vadd.f32 1.0, %v2556_v26 }
 0x545   : > { %2559 = vrcp.f32 %v1590_v27 }
 0x546   : > { %2561 = vpow2.f32 %v2099_v39 }
 0x547   : > { %2563 = vpow2.f32 %v2100_v42 }
 0x54e   : > { %v2558_v28 = vpop.eup %2557 }
 0x54f   : > { %v1595_v29 = vmul.f32 %v2558_v28, %v3023_v52 }
 0x551   : > { %v2141_v56 = vpack.c.bf16 %v1595_v29, %v1595_v29 }
 0x552   : > { %v2560_v30 = vpop.eup %2559 }
 0x553   : > { %1605 = vst [vmem:[#allocation2 + $0x4] sm:$0xf] %v2141_v56  ;;  %v1596_v31 = vmul.f32 %v2560_v30, %v3029_v61  ;;  %v2562_v35 = vpop.eup %2561 }
 0x554   : > { %v1577_v46 = vadd.f32 1.0, %v2562_v35  ;;  %v2564_v49 = vpop.eup %2563 }
 0x555   : > { %v2142_v32 = vpack.c.bf16 %v1596_v31, %v1596_v31  ;;  %v1578_v51 = vadd.f32 1.0, %v2564_v49 }
 0x557   : > { %1606 = vst [vmem:[#allocation2 + $0xc] sm:$0xf] %v2142_v32 }
 0x55e   : > { %v2512_v34 = vld [vmem:[#allocation2 + $0x4] ss:$8 sps:$4 sm:$0xff]  }
 0x55f   : > { %1788 = vmatprep.mubr.bf16.mxu1 %v2512_v34 }
 0x560   : > { %1789 = vmatmul.mubr.bf16.vlgmr.msra.gmra.mxu1 %v2510_v33 }
 0x620   : > { %v2215_v43 = vpop.f32.mrf.mxu1 }
 0x622   : > { %v2216_v37 = vpop.f32.mrf.mxu1 }
 0x623   : > { %v2217_v40 = vadd.f32 %v2216_v37, %v2215_v43 }
 0x624   : > { %v2218_v45 = vpop.f32.mrf.mxu1 }
 0x625   : > { %v1791_v47 = vadd.f32 %v2217_v40, %v2106_v44 }
 0x626   : > { %v2219_v48 = vpop.f32.mrf.mxu1 }
 0x627   : > { %2565 = vtanh.f32 %v1791_v47  ;;  %v2220_v50 = vadd.f32 %v2219_v48, %v2218_v45 }
 0x628   : > { %2567 = vrcp.f32 %v1577_v46 }
 0x629   : > { %v1794_v53 = vadd.f32 %v2220_v50, %v2106_v44 }
 0x62b   : > { %2569 = vtanh.f32 %v1794_v53 }
 0x62c   : > { %2571 = vrcp.f32 %v1578_v51 }
 0x634   : > { %v2566_v54 = vpop.eup %2565 }
 0x635   : > { %v1799_v58 = vsub.f32 %v2566_v54, %v3023_v52  ;;  %v2568_v60 = vpop.eup %2567 }
 0x637   : > { %v1801_v55 = vmul.f32 %v2568_v60, %v1799_v58 }
 0x638   : > { %v2570_v63 = vpop.eup %2569 }
 0x639   : > { %v1800_v0 = vsub.f32 %v2570_v63, %v3029_v61  ;;  %v1803_v9 = vadd.f32 %v1801_v55, %v3023_v52  ;;  %v2572_v1 = vpop.eup %2571 }
 0x63b   : > { %v1802_v57 = vmul.f32 %v2572_v1, %v1800_v0  ;;  %1805 = vst [vmem:[%s286_s23] sm:$0xff] %v1803_v9 }
 0x63d   : > { %v1804_v2 = vadd.f32 %v1802_v57, %v3029_v61 }
 0x63f   : > { %1806 = vst [vmem:[%s286_s23 + $0x8] sm:$0xff] %v1804_v2 }
 0x640   : > { %2694 = shalt.err (!%p2691_p9)
}
 0x641   : > { %s2695_s30 = scalar_lea.hbm %s3049_s9, 256  ;;  %s2699_s15 = scalar_lea.hbm %s3100_s5, 512 }
 0x642   : > { %p2696_p7 = scmp.ne.s32.totalorder %s3049_s9, %s2695_s30  ;;  %p2700_p4 = scmp.lt.s32.totalorder %s3049_s9, %s3100_s5 }
 0x643   : > { %p2701_p8 = scmp.lt.s32.totalorder %s2699_s15, %s2695_s30 }
 0x644   : > { %p2697_p13 = pnand %p2696_p7, %p3120_p0 }
 0x645   : > { %p2702_p6 = por %p2701_p8, %p2700_p4 }
 0x646   : > { %p2698_p12 = pneg %p2697_p13 }
 0x648   : > { %p2703_p11 = pnand %p2702_p6, %p2698_p12 }
 0x64a   : > { %2706 = shalt.err (!%p2703_p11)
}
 0x64b   : > { %s2766_s23 = smov 128   ;;  %s2767_s28 = smov 8  }
 0x64c   : > { %2235 = dma.vmem_to_hbm [thread:$0]  (%p3120_p0), %s3051_s29, 256, %s3049_s9, %s1808_s22, %s2766_s23, %s2766_s23, %s2767_s28  }
 0x64d PF: > { %s1836_s10 = sand.u32 1, %s2741_s18   ;;  %p3121_p5 = scmp.ne.s32.totalorder %s3107_s25, 0 }
 0x64e   : > { %p3122_p10 = scmp.ge.s32.totalorder %s2753_s21, 2  ;;  %s1837_s14 = scalar_lea.sflag [#allocation5], %s1836_s10 }
 0x650   : > { %p2252_p1 = pnand %p3122_p10, %p3121_p5 }
 0x652   : > { %p2253_p2 = pneg %p2252_p1 }
 0x654   : > { %2736 = dma.done.wait (%p2253_p2), %s1837_s14, 256  }
 0x655   : > { %2738 = vsyncadd (%p2253_p2), %s1837_s14, 4294967040  ;;  %p20_p3 = scmp.ge.s32.totalorder %s2881_s8, 4   ;;  %s3123_s18 = smov %s2745_s19 }
 0x656   : > { %s3124_s19 = smov %s2749_s20  ;;  %s3125_s20 = smov %s2891_s11 }
 0x657   : > { %s3126_s21 = smov %s2881_s8  ;;  %22 = sbr.rel (!%p20_p3) target bundleno = 7 (0x7), region = 106 }
 0x65c   :  { %1842 = vsyncpa [#allocation4], 1 }
 0x65d   :  { %1844 = vsyncpa [#allocation4 + $0x1], 1 }
 0x65e   :  { %1845 = vsyncpa [#allocation7], 1 }
 0x65f   :  { %1846 = vsyncpa [#allocation10], 1 }
 0x660   :  { %1848 = vsyncpa [#allocation10 + $0x1], 1 }
 0x661   :  { %1849 = vsyncpa [#allocation5], 1 }
 0x662   :  { %1851 = vsyncpa [#allocation5 + $0x1], 1 }

</bundles_post_ra>
